<compile_context>
chip_gen: v6e
topology: v6e:2x2x1
jax: 0.10.0
libtpu: 0.0.40
codegen_flags: <defaults>
</compile_context>

<pallas_src>
import numpy as np
import jax
import jax.numpy as jnp
from jax.experimental import pallas as pl
from jax.experimental.pallas import tpu as pltpu

_K = 7  # conv kernel_size == stride


# ---------------------------------------------------------------------------
# In-kernel helpers
# ---------------------------------------------------------------------------
def _gelu_exact(x):
    # nn.GELU() default = exact erf formulation: 0.5*x*(1+erf(x/sqrt(2)))
    inv_sqrt2 = jnp.float32(0.7071067811865476)
    return 0.5 * x * (1.0 + jax.lax.erf(x * inv_sqrt2))


# ---------------------------------------------------------------------------
# Fused kernel: conv (as block-diag matmul) + GELU + fc1..fc5 (+GELU between)
#   x_ref  : (B_t, S_used)  f32   batch tile of the input signal
#   wc_ref : (S_used, 32*L) bf16  block-diagonal conv matrix
#   bc_ref : (1, 32*L)      f32   conv bias tiled per window
#   wN_ref : (in, out)      bf16  fc weights (w1 rows pre-permuted)
#   bN_ref : (1, out)       f32
#   w5_ref : (1, 128) f32 / b5_ref : (1, 1) f32   (fc5 done on VPU)
#   o_ref  : (B_t, 1)       f32
# ---------------------------------------------------------------------------
def cnn_fused_kernel(x_ref, wc_ref, bc_ref,
                     w1_ref, b1_ref, w2_ref, b2_ref, w3_ref, b3_ref,
                     w4_ref, b4_ref, w5_ref, b5_ref, o_ref):
    # Conv1d as one lane-dense matmul; bf16 MXU path, f32 accumulation.
    xb = x_ref[...].astype(jnp.bfloat16)
    h = jnp.dot(xb, wc_ref[...], preferred_element_type=jnp.float32) + bc_ref[...]
    h = _gelu_exact(h)                                  # (B_t, 32*L) f32

    def _fc(h, w_ref, b_ref):
        return jnp.dot(h.astype(jnp.bfloat16), w_ref[...],
                       preferred_element_type=jnp.float32) + b_ref[...]

    h = _gelu_exact(_fc(h, w1_ref, b1_ref))             # (B_t, 512)
    h = _gelu_exact(_fc(h, w2_ref, b2_ref))             # (B_t, 512)
    h = _gelu_exact(_fc(h, w3_ref, b3_ref))             # (B_t, 512)
    h = _gelu_exact(_fc(h, w4_ref, b4_ref))             # (B_t, 128)

    # fc5 (128 -> 1): VPU multiply + lane reduction (skip an N=1 MXU pass).
    o_ref[...] = jnp.sum(h * w5_ref[...], axis=-1, keepdims=True) + b5_ref[...]


# ---------------------------------------------------------------------------
# Wrapper
# ---------------------------------------------------------------------------
def _round_up(n, m):
    return (n + m - 1) // m * m


def cnn_forward(x, kparams, *, block_b=512):
    """x: (B, 1, S) float32 (PyTorch NCL layout).  Returns (B, 1) float32."""
    B, C, S = x.shape
    assert C == 1
    L = (S - _K) // _K + 1
    s_used = L * _K
    assert kparams["wc"].shape == (s_used, 32 * L)

    x2 = x[:, 0, :s_used]                               # (B, S_used)

    # Batch tile: multiple of 8 sublanes, capped so VMEM stays well inside the
    # default scoped limit on every generation (v5e 16 MiB .. v7x 32/64 MiB).
    b_t = min(block_b, _round_up(B, 8))
    b_pad = _round_up(B, b_t)
    if b_pad != B:
        x2 = jnp.pad(x2, ((0, b_pad - B), (0, 0)))

    def _resident(arr):
        shape = arr.shape
        return pl.BlockSpec(shape, lambda b: (0,) * len(shape))

    weight_args = (kparams["wc"], kparams["bc"],
                   kparams["w1"], kparams["b1"],
                   kparams["w2"], kparams["b2"],
                   kparams["w3"], kparams["b3"],
                   kparams["w4"], kparams["b4"],
                   kparams["w5"], kparams["b5"])

    out = pl.pallas_call(
        cnn_fused_kernel,
        out_shape=jax.ShapeDtypeStruct((b_pad, 1), jnp.float32),
        grid=(b_pad // b_t,),
        in_specs=[pl.BlockSpec((b_t, s_used), lambda b: (b, 0))]
                 + [_resident(a) for a in weight_args],
        out_specs=pl.BlockSpec((b_t, 1), lambda b: (b, 0)),
        compiler_params=pltpu.CompilerParams(
            dimension_semantics=("parallel",)),      # 2 TCs on v7x, no-op else
    )(x2, *weight_args)
    return out[:B]


# ---------------------------------------------------------------------------
# Deterministic PyTorch-layout params (uniform +-1/sqrt(fan_in), nn defaults)
# ---------------------------------------------------------------------------
def init_params_pt(key, size):
    L = (size - _K) // _K + 1
    fc1_in = 32 * L

    def u(k, shape, fan_in):
        bound = 1.0 / np.sqrt(fan_in)
        return jax.random.uniform(k, shape, jnp.float32, -bound, bound)

    ks = jax.random.split(key, 12)
    return {
        "conv_w": u(ks[0], (32, 1, _K), _K),            # (out, in, k)
        "conv_b": u(ks[1], (32,), _K),
        "fc1_w": u(ks[2], (512, fc1_in), fc1_in), "fc1_b": u(ks[3], (512,), fc1_in),
        "fc2_w": u(ks[4], (512, 512), 512),       "fc2_b": u(ks[5], (512,), 512),
        "fc3_w": u(ks[6], (512, 512), 512),       "fc3_b": u(ks[7], (512,), 512),
        "fc4_w": u(ks[8], (128, 512), 512),       "fc4_b": u(ks[9], (128,), 512),
        "fc5_w": u(ks[10], (1, 128), 128),        "fc5_b": u(ks[11], (1,), 128),
    }


def prepare_kernel_params(p, size):
    """One-time conversion: block-diag conv matrix, fc1 row permutation
    (absorbs PyTorch's channel-major view(B,-1)), bf16 weights."""
    L = (size - _K) // _K + 1

    wck = p["conv_w"][:, 0, :].T                         # (7, 32)  [k, c]
    wc = jnp.kron(jnp.eye(L, dtype=jnp.float32), wck)    # (7L, 32L) block-diag
    bc = jnp.tile(p["conv_b"], L).reshape(1, 32 * L)     # bc[0, l*32+c] = conv_b[c]

    # fc1.weight.T has rows indexed c*L + l; conv output columns are l*32 + c.
    w1_t = p["fc1_w"].T                                  # (32*L, 512)
    w1_perm = w1_t.reshape(32, L, 512).transpose(1, 0, 2).reshape(32 * L, 512)

    bf16 = jnp.bfloat16
    return {
        "wc": wc.astype(bf16), "bc": bc,
        "w1": w1_perm.astype(bf16),        "b1": p["fc1_b"].reshape(1, 512),
        "w2": p["fc2_w"].T.astype(bf16),   "b2": p["fc2_b"].reshape(1, 512),
        "w3": p["fc3_w"].T.astype(bf16),   "b3": p["fc3_b"].reshape(1, 512),
        "w4": p["fc4_w"].T.astype(bf16),   "b4": p["fc4_b"].reshape(1, 128),
        "w5": p["fc5_w"].astype(jnp.float32),             # (1, 128) — VPU path
        "b5": p["fc5_b"].reshape(1, 1),
    }


# ---------------------------------------------------------------------------
# Pure-JAX reference (exact PyTorch semantics, f32) for a sanity check
# ---------------------------------------------------------------------------
def reference_forward(x, p):
    B, _, S = x.shape
    L = (S - _K) // _K + 1
    xp = x[:, 0, :L * _K].reshape(B, L, _K)
    conv = jnp.einsum("blk,ck->bcl", xp, p["conv_w"][:, 0, :]) \
        + p["conv_b"][None, :, None]
    h = jax.nn.gelu(conv, approximate=False).reshape(B, 32 * L)  # channel-major
    for i in (1, 2, 3, 4):
        h = jax.nn.gelu(h @ p[f"fc{i}_w"].T + p[f"fc{i}_b"], approximate=False)
    return h @ p["fc5_w"].T + p["fc5_b"]


if __name__ == "__main__":
    key = jax.random.PRNGKey(0)
    k_param, k_x = jax.random.split(key)

    # Small shapes consistent with the module: size=112 -> L=16 -> fc1_in=512
    B, size = 2, 112
    params_pt = init_params_pt(k_param, size)
    kparams = prepare_kernel_params(params_pt, size)
    x = jax.random.normal(k_x, (B, 1, size), dtype=jnp.float32)

    out = jax.block_until_ready(cnn_forward(x, kparams))
    assert out.shape == (B, 1), out.shape
    assert bool(jnp.all(jnp.isfinite(out)))

    ref = reference_forward(x, params_pt)
    assert bool(jnp.allclose(out, ref, rtol=1e-1, atol=1e-1)), (out, ref)

    print("KERNEL_OK")
</pallas_src>

<mosaic_0001>
module attributes {stable_mosaic.version = 11 : i64} {
  func.func @cnn_fused_kernel(%arg0: i32, %arg1: memref<8x112xf32, #tpu.memory_space<vmem>>, %arg2: memref<112x512xbf16, #tpu.memory_space<vmem>>, %arg3: memref<1x512xf32, #tpu.memory_space<vmem>>, %arg4: memref<512x512xbf16, #tpu.memory_space<vmem>>, %arg5: memref<1x512xf32, #tpu.memory_space<vmem>>, %arg6: memref<512x512xbf16, #tpu.memory_space<vmem>>, %arg7: memref<1x512xf32, #tpu.memory_space<vmem>>, %arg8: memref<512x512xbf16, #tpu.memory_space<vmem>>, %arg9: memref<1x512xf32, #tpu.memory_space<vmem>>, %arg10: memref<512x128xbf16, #tpu.memory_space<vmem>>, %arg11: memref<1x128xf32, #tpu.memory_space<vmem>>, %arg12: memref<1x128xf32, #tpu.memory_space<vmem>>, %arg13: memref<1x1xf32, #tpu.memory_space<vmem>>, %arg14: memref<8x1xf32, #tpu.memory_space<vmem>>) attributes {dimension_semantics = [#tpu.dimension_semantics<parallel>], iteration_bounds = array<i64: 1>, scalar_prefetch = 0 : i64, scratch_operands = 0 : i64, tpu.core_type = #tpu.core_type<tc>, window_params = [{transform_indices = @transform_0, window_bounds = array<i64: 8, 112>}, {pipeline_mode = #tpu.pipeline_mode<synchronous>, transform_indices = @transform_1, window_bounds = array<i64: 112, 512>}, {pipeline_mode = #tpu.pipeline_mode<synchronous>, transform_indices = @transform_2, window_bounds = array<i64: 1, 512>}, {pipeline_mode = #tpu.pipeline_mode<synchronous>, transform_indices = @transform_3, window_bounds = array<i64: 512, 512>}, {pipeline_mode = #tpu.pipeline_mode<synchronous>, transform_indices = @transform_4, window_bounds = array<i64: 1, 512>}, {pipeline_mode = #tpu.pipeline_mode<synchronous>, transform_indices = @transform_5, window_bounds = array<i64: 512, 512>}, {pipeline_mode = #tpu.pipeline_mode<synchronous>, transform_indices = @transform_6, window_bounds = array<i64: 1, 512>}, {pipeline_mode = #tpu.pipeline_mode<synchronous>, transform_indices = @transform_7, window_bounds = array<i64: 512, 512>}, {pipeline_mode = #tpu.pipeline_mode<synchronous>, transform_indices = @transform_8, window_bounds = array<i64: 1, 512>}, {pipeline_mode = #tpu.pipeline_mode<synchronous>, transform_indices = @transform_9, window_bounds = array<i64: 512, 128>}, {pipeline_mode = #tpu.pipeline_mode<synchronous>, transform_indices = @transform_10, window_bounds = array<i64: 1, 128>}, {pipeline_mode = #tpu.pipeline_mode<synchronous>, transform_indices = @transform_11, window_bounds = array<i64: 1, 128>}, {pipeline_mode = #tpu.pipeline_mode<synchronous>, transform_indices = @transform_12, window_bounds = array<i64: 1, 1>}, {transform_indices = @transform_13, window_bounds = array<i64: 8, 1>}]} {
    %c0 = arith.constant 0 : index
    %c0_0 = arith.constant 0 : index
    %0 = vector.load %arg1[%c0, %c0_0] : memref<8x112xf32, #tpu.memory_space<vmem>>, vector<8x112xf32>
    %1 = arith.truncf %0 : vector<8x112xf32> to vector<8x112xbf16>
    %c0_1 = arith.constant 0 : index
    %c0_2 = arith.constant 0 : index
    %2 = vector.load %arg2[%c0_1, %c0_2] : memref<112x512xbf16, #tpu.memory_space<vmem>>, vector<112x512xbf16>
    %cst = arith.constant dense<0.000000e+00> : vector<8x512xf32>
    %3 = tpu.matmul %1, %2, %cst {dimension_numbers = #tpu.dot_dimension_numbers<[1], [0], [0], [1], [0, 0, 1, 1], [], []>} : vector<8x112xbf16>, vector<112x512xbf16>, vector<8x512xf32> -> vector<8x512xf32>
    %c0_3 = arith.constant 0 : index
    %c0_4 = arith.constant 0 : index
    %4 = vector.load %arg3[%c0_3, %c0_4] : memref<1x512xf32, #tpu.memory_space<vmem>>, vector<1x512xf32>
    %5 = vector.broadcast %4 : vector<1x512xf32> to vector<8x512xf32>
    %6 = arith.addf %3, %5 : vector<8x512xf32>
    %cst_5 = arith.constant 5.000000e-01 : f32
    %7 = vector.broadcast %cst_5 : f32 to vector<8x512xf32>
    %8 = arith.mulf %7, %6 : vector<8x512xf32>
    %cst_6 = arith.constant 0.707106769 : f32
    %9 = vector.broadcast %cst_6 : f32 to vector<8x512xf32>
    %10 = arith.mulf %6, %9 : vector<8x512xf32>
    %11 = math.erf %10 : vector<8x512xf32>
    %cst_7 = arith.constant 1.000000e+00 : f32
    %12 = vector.broadcast %cst_7 : f32 to vector<8x512xf32>
    %13 = arith.addf %12, %11 : vector<8x512xf32>
    %14 = arith.mulf %8, %13 : vector<8x512xf32>
    %15 = arith.truncf %14 : vector<8x512xf32> to vector<8x512xbf16>
    %c0_8 = arith.constant 0 : index
    %c0_9 = arith.constant 0 : index
    %16 = vector.load %arg4[%c0_8, %c0_9] : memref<512x512xbf16, #tpu.memory_space<vmem>>, vector<512x512xbf16>
    %cst_10 = arith.constant dense<0.000000e+00> : vector<8x512xf32>
    %17 = tpu.matmul %15, %16, %cst_10 {dimension_numbers = #tpu.dot_dimension_numbers<[1], [0], [0], [1], [0, 0, 1, 1], [], []>} : vector<8x512xbf16>, vector<512x512xbf16>, vector<8x512xf32> -> vector<8x512xf32>
    %c0_11 = arith.constant 0 : index
    %c0_12 = arith.constant 0 : index
    %18 = vector.load %arg5[%c0_11, %c0_12] : memref<1x512xf32, #tpu.memory_space<vmem>>, vector<1x512xf32>
    %19 = vector.broadcast %18 : vector<1x512xf32> to vector<8x512xf32>
    %20 = arith.addf %17, %19 : vector<8x512xf32>
    %cst_13 = arith.constant 5.000000e-01 : f32
    %21 = vector.broadcast %cst_13 : f32 to vector<8x512xf32>
    %22 = arith.mulf %21, %20 : vector<8x512xf32>
    %cst_14 = arith.constant 0.707106769 : f32
    %23 = vector.broadcast %cst_14 : f32 to vector<8x512xf32>
    %24 = arith.mulf %20, %23 : vector<8x512xf32>
    %25 = math.erf %24 : vector<8x512xf32>
    %cst_15 = arith.constant 1.000000e+00 : f32
    %26 = vector.broadcast %cst_15 : f32 to vector<8x512xf32>
    %27 = arith.addf %26, %25 : vector<8x512xf32>
    %28 = arith.mulf %22, %27 : vector<8x512xf32>
    %29 = arith.truncf %28 : vector<8x512xf32> to vector<8x512xbf16>
    %c0_16 = arith.constant 0 : index
    %c0_17 = arith.constant 0 : index
    %30 = vector.load %arg6[%c0_16, %c0_17] : memref<512x512xbf16, #tpu.memory_space<vmem>>, vector<512x512xbf16>
    %cst_18 = arith.constant dense<0.000000e+00> : vector<8x512xf32>
    %31 = tpu.matmul %29, %30, %cst_18 {dimension_numbers = #tpu.dot_dimension_numbers<[1], [0], [0], [1], [0, 0, 1, 1], [], []>} : vector<8x512xbf16>, vector<512x512xbf16>, vector<8x512xf32> -> vector<8x512xf32>
    %c0_19 = arith.constant 0 : index
    %c0_20 = arith.constant 0 : index
    %32 = vector.load %arg7[%c0_19, %c0_20] : memref<1x512xf32, #tpu.memory_space<vmem>>, vector<1x512xf32>
    %33 = vector.broadcast %32 : vector<1x512xf32> to vector<8x512xf32>
    %34 = arith.addf %31, %33 : vector<8x512xf32>
    %cst_21 = arith.constant 5.000000e-01 : f32
    %35 = vector.broadcast %cst_21 : f32 to vector<8x512xf32>
    %36 = arith.mulf %35, %34 : vector<8x512xf32>
    %cst_22 = arith.constant 0.707106769 : f32
    %37 = vector.broadcast %cst_22 : f32 to vector<8x512xf32>
    %38 = arith.mulf %34, %37 : vector<8x512xf32>
    %39 = math.erf %38 : vector<8x512xf32>
    %cst_23 = arith.constant 1.000000e+00 : f32
    %40 = vector.broadcast %cst_23 : f32 to vector<8x512xf32>
    %41 = arith.addf %40, %39 : vector<8x512xf32>
    %42 = arith.mulf %36, %41 : vector<8x512xf32>
    %43 = arith.truncf %42 : vector<8x512xf32> to vector<8x512xbf16>
    %c0_24 = arith.constant 0 : index
    %c0_25 = arith.constant 0 : index
    %44 = vector.load %arg8[%c0_24, %c0_25] : memref<512x512xbf16, #tpu.memory_space<vmem>>, vector<512x512xbf16>
    %cst_26 = arith.constant dense<0.000000e+00> : vector<8x512xf32>
    %45 = tpu.matmul %43, %44, %cst_26 {dimension_numbers = #tpu.dot_dimension_numbers<[1], [0], [0], [1], [0, 0, 1, 1], [], []>} : vector<8x512xbf16>, vector<512x512xbf16>, vector<8x512xf32> -> vector<8x512xf32>
    %c0_27 = arith.constant 0 : index
    %c0_28 = arith.constant 0 : index
    %46 = vector.load %arg9[%c0_27, %c0_28] : memref<1x512xf32, #tpu.memory_space<vmem>>, vector<1x512xf32>
    %47 = vector.broadcast %46 : vector<1x512xf32> to vector<8x512xf32>
    %48 = arith.addf %45, %47 : vector<8x512xf32>
    %cst_29 = arith.constant 5.000000e-01 : f32
    %49 = vector.broadcast %cst_29 : f32 to vector<8x512xf32>
    %50 = arith.mulf %49, %48 : vector<8x512xf32>
    %cst_30 = arith.constant 0.707106769 : f32
    %51 = vector.broadcast %cst_30 : f32 to vector<8x512xf32>
    %52 = arith.mulf %48, %51 : vector<8x512xf32>
    %53 = math.erf %52 : vector<8x512xf32>
    %cst_31 = arith.constant 1.000000e+00 : f32
    %54 = vector.broadcast %cst_31 : f32 to vector<8x512xf32>
    %55 = arith.addf %54, %53 : vector<8x512xf32>
    %56 = arith.mulf %50, %55 : vector<8x512xf32>
    %57 = arith.truncf %56 : vector<8x512xf32> to vector<8x512xbf16>
    %c0_32 = arith.constant 0 : index
    %c0_33 = arith.constant 0 : index
    %58 = vector.load %arg10[%c0_32, %c0_33] : memref<512x128xbf16, #tpu.memory_space<vmem>>, vector<512x128xbf16>
    %cst_34 = arith.constant dense<0.000000e+00> : vector<8x128xf32>
    %59 = tpu.matmul %57, %58, %cst_34 {dimension_numbers = #tpu.dot_dimension_numbers<[1], [0], [0], [1], [0, 0, 1, 1], [], []>} : vector<8x512xbf16>, vector<512x128xbf16>, vector<8x128xf32> -> vector<8x128xf32>
    %c0_35 = arith.constant 0 : index
    %c0_36 = arith.constant 0 : index
    %60 = vector.load %arg11[%c0_35, %c0_36] : memref<1x128xf32, #tpu.memory_space<vmem>>, vector<1x128xf32>
    %61 = vector.broadcast %60 : vector<1x128xf32> to vector<8x128xf32>
    %62 = arith.addf %59, %61 : vector<8x128xf32>
    %cst_37 = arith.constant 5.000000e-01 : f32
    %63 = vector.broadcast %cst_37 : f32 to vector<8x128xf32>
    %64 = arith.mulf %63, %62 : vector<8x128xf32>
    %cst_38 = arith.constant 0.707106769 : f32
    %65 = vector.broadcast %cst_38 : f32 to vector<8x128xf32>
    %66 = arith.mulf %62, %65 : vector<8x128xf32>
    %67 = math.erf %66 : vector<8x128xf32>
    %cst_39 = arith.constant 1.000000e+00 : f32
    %68 = vector.broadcast %cst_39 : f32 to vector<8x128xf32>
    %69 = arith.addf %68, %67 : vector<8x128xf32>
    %70 = arith.mulf %64, %69 : vector<8x128xf32>
    %c0_40 = arith.constant 0 : index
    %c0_41 = arith.constant 0 : index
    %71 = vector.load %arg12[%c0_40, %c0_41] : memref<1x128xf32, #tpu.memory_space<vmem>>, vector<1x128xf32>
    %72 = vector.broadcast %71 : vector<1x128xf32> to vector<8x128xf32>
    %73 = arith.mulf %70, %72 : vector<8x128xf32>
    %cst_42 = arith.constant dense<0.000000e+00> : vector<8xf32>
    %74 = vector.multi_reduction <add>, %73, %cst_42 [1] : vector<8x128xf32> to vector<8xf32>
    %75 = vector.shape_cast %74 : vector<8xf32> to vector<8x1xf32>
    %c0_43 = arith.constant 0 : index
    %c0_44 = arith.constant 0 : index
    %76 = vector.load %arg13[%c0_43, %c0_44] : memref<1x1xf32, #tpu.memory_space<vmem>>, vector<1x1xf32>
    %77 = vector.broadcast %76 : vector<1x1xf32> to vector<8x1xf32>
    %78 = arith.addf %75, %77 : vector<8x1xf32>
    %c0_45 = arith.constant 0 : index
    %c0_46 = arith.constant 0 : index
    %79 = vector.load %arg14[%c0_45, %c0_46] : memref<8x1xf32, #tpu.memory_space<vmem>>, vector<8x1xf32>
    tpu.vector_store %arg14[%c0_45, %c0_46], %78 {strides = array<i32>} : memref<8x1xf32, #tpu.memory_space<vmem>>, vector<8x1xf32>,
    return
  }
  func.func @transform_0(%arg0: i32) -> (i32, i32) {
    %c0_i32 = arith.constant 0 : i32
    %c0_i32_0 = arith.constant 0 : i32
    return %arg0, %c0_i32 : i32, i32
  }
  func.func @transform_1(%arg0: i32) -> (i32, i32) {
    %c0_i32 = arith.constant 0 : i32
    %c0_i32_0 = arith.constant 0 : i32
    %c0_i32_1 = arith.constant 0 : i32
    return %c0_i32, %c0_i32_0 : i32, i32
  }
  func.func @transform_2(%arg0: i32) -> (i32, i32) {
    %c0_i32 = arith.constant 0 : i32
    %c0_i32_0 = arith.constant 0 : i32
    %c0_i32_1 = arith.constant 0 : i32
    return %c0_i32, %c0_i32_0 : i32, i32
  }
  func.func @transform_3(%arg0: i32) -> (i32, i32) {
    %c0_i32 = arith.constant 0 : i32
    %c0_i32_0 = arith.constant 0 : i32
    %c0_i32_1 = arith.constant 0 : i32
    return %c0_i32, %c0_i32_0 : i32, i32
  }
  func.func @transform_4(%arg0: i32) -> (i32, i32) {
    %c0_i32 = arith.constant 0 : i32
    %c0_i32_0 = arith.constant 0 : i32
    %c0_i32_1 = arith.constant 0 : i32
    return %c0_i32, %c0_i32_0 : i32, i32
  }
  func.func @transform_5(%arg0: i32) -> (i32, i32) {
    %c0_i32 = arith.constant 0 : i32
    %c0_i32_0 = arith.constant 0 : i32
    %c0_i32_1 = arith.constant 0 : i32
    return %c0_i32, %c0_i32_0 : i32, i32
  }
  func.func @transform_6(%arg0: i32) -> (i32, i32) {
    %c0_i32 = arith.constant 0 : i32
    %c0_i32_0 = arith.constant 0 : i32
    %c0_i32_1 = arith.constant 0 : i32
    return %c0_i32, %c0_i32_0 : i32, i32
  }
  func.func @transform_7(%arg0: i32) -> (i32, i32) {
    %c0_i32 = arith.constant 0 : i32
    %c0_i32_0 = arith.constant 0 : i32
    %c0_i32_1 = arith.constant 0 : i32
    return %c0_i32, %c0_i32_0 : i32, i32
  }
  func.func @transform_8(%arg0: i32) -> (i32, i32) {
    %c0_i32 = arith.constant 0 : i32
    %c0_i32_0 = arith.constant 0 : i32
    %c0_i32_1 = arith.constant 0 : i32
    return %c0_i32, %c0_i32_0 : i32, i32
  }
  func.func @transform_9(%arg0: i32) -> (i32, i32) {
    %c0_i32 = arith.constant 0 : i32
    %c0_i32_0 = arith.constant 0 : i32
    %c0_i32_1 = arith.constant 0 : i32
    return %c0_i32, %c0_i32_0 : i32, i32
  }
  func.func @transform_10(%arg0: i32) -> (i32, i32) {
    %c0_i32 = arith.constant 0 : i32
    %c0_i32_0 = arith.constant 0 : i32
    %c0_i32_1 = arith.constant 0 : i32
    return %c0_i32, %c0_i32_0 : i32, i32
  }
  func.func @transform_11(%arg0: i32) -> (i32, i32) {
    %c0_i32 = arith.constant 0 : i32
    %c0_i32_0 = arith.constant 0 : i32
    %c0_i32_1 = arith.constant 0 : i32
    return %c0_i32, %c0_i32_0 : i32, i32
  }
  func.func @transform_12(%arg0: i32) -> (i32, i32) {
    %c0_i32 = arith.constant 0 : i32
    %c0_i32_0 = arith.constant 0 : i32
    %c0_i32_1 = arith.constant 0 : i32
    return %c0_i32, %c0_i32_0 : i32, i32
  }
  func.func @transform_13(%arg0: i32) -> (i32, i32) {
    %c0_i32 = arith.constant 0 : i32
    %c0_i32_0 = arith.constant 0 : i32
    return %arg0, %c0_i32 : i32, i32
  }
}

</mosaic_0001>

<bundles_post_ra>
// kernel: tpu_custom_call.1
= control target key start
LH: loop header
LB: loop body
LE: loop exit
PB: predicated region body
PF: predicated region fallthrough
CT: control target
= control target key end

     0   :  { %s5256_s0 = inlined_call_operand.hbm [shape: f32[8,112], index: 0, kind: input, shape index: {}]   ;;  %s5257_s1 = inlined_call_operand.hbm [shape: bf16[112,512], index: 1, kind: input, shape index: {}]   ;;  %s5258_s2 = inlined_call_operand.vmem [shape: f32[1,512], index: 2, kind: input, shape index: {}]   ;;  %s5259_s3 = inlined_call_operand.hbm [shape: bf16[512,512], index: 3, kind: input, shape index: {}]   ;;  %s5260_s4 = inlined_call_operand.vmem [shape: f32[1,512], index: 4, kind: input, shape index: {}]   ;;  %s5261_s5 = inlined_call_operand.hbm [shape: bf16[512,512], index: 5, kind: input, shape index: {}]   ;;  %s5262_s6 = inlined_call_operand.vmem [shape: f32[1,512], index: 6, kind: input, shape index: {}]   ;;  %s5263_s7 = inlined_call_operand.hbm [shape: bf16[512,512], index: 7, kind: input, shape index: {}]   ;;  %s5264_s8 = inlined_call_operand.vmem [shape: f32[1,512], index: 8, kind: input, shape index: {}]   ;;  %s5265_s9 = inlined_call_operand.hbm [shape: bf16[512,128], index: 9, kind: input, shape index: {}]   ;;  %s5266_s10 = inlined_call_operand.vmem [shape: f32[1,128], index: 10, kind: input, shape index: {}]   ;;  %s5267_s11 = inlined_call_operand.vmem [shape: f32[1,128], index: 11, kind: input, shape index: {}]   ;;  %s5268_s12 = inlined_call_operand.<no memory space> [shape: f32[1,1], index: 12, kind: input, shape index: {}]   ;;  %s5269_s13 = inlined_call_operand.vmem [shape: f32[8,1], index: 13, kind: output, shape index: {}]  }
   0x1   :  { %v18_v0 = vstv %s5268_s12 }
   0x2   :  { %19 = vst [vmem:[#allocation2] sm:$0x1] %v18_v0 }
   0x3   :  { %20 = vsyncpa [#allocation4], 0 }
   0x4   :  { %21 = vsyncpa [#allocation6], 0 }
   0x5   :  { %22 = vsyncpa [#allocation9], 0 }
   0x6   :  { %23 = vsyncpa [#allocation12], 0  ;;  %s5055_s27 = smov [#allocation5]  }
   0x7   :  { %s39_s28 = sshll.u32 %s5055_s27, 4  ;;  %s40_s28 = int_to_ptr.vmem [resolvable:$true] %s39_s28 }
   0x8   :  { %s4935_s29 = scalar_lea.vmem %s40_s28, 3584  ;;  %p4940_p1 = scmp.lt.s32.totalorder %s40_s28, %s40_s28 }
   0x9   :  { %p4936_p0 = scmp.ne.s32.totalorder %s40_s28, %s4935_s29  ;;  %p4941_p2 = scmp.lt.s32.totalorder %s4935_s29, %s4935_s29 }
   0xb   :  { %p4942_p3 = por %p4941_p2, %p4940_p1 }
   0xd   :  { %p4943_p4 = pnand %p4942_p3, %p4936_p0 }
   0xf   :  { %4946 = shalt.err (!%p4943_p4)
}
  0x10   :  { %s5056_s30 = smov 256   ;;  %s5057_s14 = smov 16  }
  0x11   :  { %45 = dma.hbm_to_vmem [thread:$0]  %s5257_s1, 3584, %s40_s28, [#allocation6], %s5056_s30, %s5056_s30, %s5057_s14  }
  0x12   :  { %s5058_s16 = smov [#allocation8]   ;;  %s5059_s18 = smov [#allocation3]  }
  0x13   :  { %s67_s17 = sshll.u32 %s5058_s16, 4  ;;  %s30_s19 = sshll.u32 %s5059_s18, 4  ;;  %s68_s17 = int_to_ptr.vmem [resolvable:$true] %s67_s17  ;;  %s31_s19 = int_to_ptr.vmem [resolvable:$true] %s30_s19 }
  0x14   :  { %s4955_s20 = scalar_lea.vmem %s68_s17, 16384  ;;  %p4960_p6 = scmp.lt.s32.totalorder %s68_s17, %s68_s17 }
  0x15   :  { %p4956_p5 = scmp.ne.s32.totalorder %s68_s17, %s4955_s20  ;;  %p4961_p7 = scmp.lt.s32.totalorder %s4955_s20, %s4955_s20 }
  0x17   :  { %p4962_p8 = por %p4961_p7, %p4960_p6 }
  0x19   :  { %p4963_p9 = pnand %p4962_p8, %p4956_p5 }
  0x1b   :  { %4966 = shalt.err (!%p4963_p9)
}
  0x1c   :  { %73 = dma.hbm_to_vmem [thread:$0]  %s5261_s5, 16384, %s68_s17, [#allocation9], %s5056_s30, %s5056_s30, %s5057_s14  }
  0x1d   :  { %s4975_s1 = scalar_lea.vmem %s31_s19, 128  ;;  %p4980_p11 = scmp.lt.s32.totalorder %s31_s19, %s31_s19 }
  0x1e   :  { %p4976_p10 = scmp.ne.s32.totalorder %s31_s19, %s4975_s1  ;;  %p4981_p12 = scmp.lt.s32.totalorder %s4975_s1, %s4975_s1 }
  0x20   :  { %p4982_p13 = por %p4981_p12, %p4980_p11 }
  0x22   :  { %p4983_p0 = pnand %p4982_p13, %p4976_p10 }
  0x24   :  { %4986 = shalt.err (!%p4983_p0)
}
  0x25   :  { %33 = dma.hbm_to_vmem [thread:$0]  %s5256_s0, 128, %s31_s19, [#allocation4]  }
  0x26   :  { %s5060_s25 = smov [#allocation7]   ;;  %s5061_s27 = smov [#allocation10]  }
  0x27   :  { %s53_s26 = sshll.u32 %s5060_s25, 4  ;;  %s81_s28 = sshll.u32 %s5061_s27, 4  ;;  %s54_s26 = int_to_ptr.vmem [resolvable:$true] %s53_s26  ;;  %s82_s28 = int_to_ptr.vmem [resolvable:$true] %s81_s28 }
  0x28   :  { %s4995_s29 = scalar_lea.vmem %s54_s26, 16384  ;;  %p5000_p2 = scmp.lt.s32.totalorder %s54_s26, %s54_s26 }
  0x29   :  { %p4996_p1 = scmp.ne.s32.totalorder %s54_s26, %s4995_s29  ;;  %p5001_p3 = scmp.lt.s32.totalorder %s4995_s29, %s4995_s29 }
  0x2b   :  { %p5002_p4 = por %p5001_p3, %p5000_p2 }
  0x2d   :  { %p5003_p5 = pnand %p5002_p4, %p4996_p1 }
  0x2f   :  { %5006 = shalt.err (!%p5003_p5)
}
  0x30   :  { %59 = dma.hbm_to_vmem [thread:$0]  %s5259_s3, 16384, %s54_s26, [#allocation6], %s5056_s30, %s5056_s30, %s5057_s14  }
  0x31   :  { %s5015_s0 = scalar_lea.vmem %s82_s28, 16384  ;;  %p5020_p7 = scmp.lt.s32.totalorder %s82_s28, %s82_s28 }
  0x32   :  { %p5016_p6 = scmp.ne.s32.totalorder %s82_s28, %s5015_s0  ;;  %p5021_p8 = scmp.lt.s32.totalorder %s5015_s0, %s5015_s0 }
  0x34   :  { %p5022_p9 = por %p5021_p8, %p5020_p7 }
  0x36   :  { %p5023_p10 = pnand %p5022_p9, %p5016_p6 }
  0x38   :  { %5026 = shalt.err (!%p5023_p10)
}
  0x39   :  { %87 = dma.hbm_to_vmem [thread:$0]  %s5263_s7, 16384, %s82_s28, [#allocation9], %s5056_s30, %s5056_s30, %s5057_s14  }
  0x3a   :  { %s5062_s17 = smov [#allocation11]  }
  0x3b   :  { %s95_s18 = sshll.u32 %s5062_s17, 4  ;;  %s96_s18 = int_to_ptr.vmem [resolvable:$true] %s95_s18 }
  0x3c   :  { %s5035_s19 = scalar_lea.vmem %s96_s18, 4096  ;;  %p5040_p12 = scmp.lt.s32.totalorder %s96_s18, %s96_s18 }
  0x3d   :  { %p5036_p11 = scmp.ne.s32.totalorder %s96_s18, %s5035_s19  ;;  %p5041_p13 = scmp.lt.s32.totalorder %s5035_s19, %s5035_s19 }
  0x3f   :  { %p5042_p0 = por %p5041_p13, %p5040_p12 }
  0x41   :  { %p5043_p1 = pnand %p5042_p0, %p5036_p11 }
  0x43   :  { %5046 = shalt.err (!%p5043_p1)
}
  0x44   :  { %s5063_s3 = smov 64   ;;  %s5064_s20 = smov 4  }
  0x45   :  { %101 = dma.hbm_to_vmem [thread:$0]  %s5265_s9, 4096, %s96_s18, [#allocation12], %s5063_s3, %s5063_s3, %s5064_s20  }
  0x46   :  { %5047 = dma.done.wait [#allocation4], 128  }
  0x47   :  { %5048 = vsyncadd [#allocation4], 4294967168 }
  0x48   :  { %5049 = dma.done.wait [#allocation6], 19968  }
  0x49   :  { %5050 = vsyncadd [#allocation6], 4294947328 }
  0x4a   :  { %5051 = dma.done.wait [#allocation9], 32768  }
  0x4b   :  { %5052 = vsyncadd [#allocation9], 4294934528 }
  0x4c   :  { %5053 = dma.done.wait [#allocation12], 4096  }
  0x4d   :  { %5054 = vsyncadd [#allocation12], 4294963200  ;;  %v5065_v1 = vmov 0   ;;  %v4243_v2 = vld [vmem:[#allocation5 + $0xc4] ss:$16 sps:$4 sm:$0xff]   ;;  %v127_v30 = vld [vmem:[#allocation3] sm:$0xff] }
  0x4e   :  { %355 = vmatprep.mubr.bf16.mxu0 %v5065_v1  ;;  %396 = vmatprep.mubr.bf16.mxu1 %v5065_v1  ;;  %v4245_v3 = vld [vmem:[#allocation5 + $0xcc] ss:$16 sps:$4 sm:$0xff]   ;;  %v4247_v4 = vld [vmem:[#allocation5 + $0xc0] ss:$16 sps:$4 sm:$0xff]   ;;  %v4248_v5 = vld [vmem:[#allocation5 + $0xc8] ss:$16 sps:$4 sm:$0xff]   ;;  %v128_v33 = vpack.c.bf16 %v127_v30, %v127_v30 }
  0x4f   :  { %325 = vmatprep.subr.bf16.mxu0 %v4243_v2  ;;  %366 = vmatprep.subr.bf16.mxu1 %v4245_v3  ;;  %v4249_v6 = vld [vmem:[#allocation5 + $0xa4] ss:$16 sps:$4 sm:$0xff]   ;;  %v4251_v7 = vld [vmem:[#allocation5 + $0xac] ss:$16 sps:$4 sm:$0xff]   ;;  %v4253_v8 = vld [vmem:[#allocation5 + $0xa0] ss:$16 sps:$4 sm:$0xff]  }
  0x50   :  { %326 = vmatpush1.bf16.msra.mxu0 %v4247_v4  ;;  %367 = vmatpush1.bf16.msra.mxu1 %v4248_v5  ;;  %v4254_v9 = vld [vmem:[#allocation5 + $0xa8] ss:$16 sps:$4 sm:$0xff]   ;;  %v4255_v10 = vld [vmem:[#allocation5 + $0x84] ss:$16 sps:$4 sm:$0xff]   ;;  %v4257_v11 = vld [vmem:[#allocation5 + $0x8c] ss:$16 sps:$4 sm:$0xff]  }
  0x51   :  { %327 = vmatprep.subr.bf16.mxu0 %v4249_v6  ;;  %368 = vmatprep.subr.bf16.mxu1 %v4251_v7  ;;  %v4259_v12 = vld [vmem:[#allocation5 + $0x80] ss:$16 sps:$4 sm:$0xff]   ;;  %v4260_v13 = vld [vmem:[#allocation5 + $0x88] ss:$16 sps:$4 sm:$0xff]   ;;  %v4261_v14 = vld [vmem:[#allocation5 + $0x64] ss:$16 sps:$4 sm:$0xff]  }
  0x52   :  { %v4263_v15 = vld [vmem:[#allocation5 + $0x6c] ss:$16 sps:$4 sm:$0xff]   ;;  %v4265_v16 = vld [vmem:[#allocation5 + $0x60] ss:$16 sps:$4 sm:$0xff]   ;;  %v4266_v17 = vld [vmem:[#allocation5 + $0x68] ss:$16 sps:$4 sm:$0xff]  }
  0x53   :  { %v4267_v18 = vld [vmem:[#allocation5 + $0x44] ss:$16 sps:$4 sm:$0xff]   ;;  %v4269_v19 = vld [vmem:[#allocation5 + $0x4c] ss:$16 sps:$4 sm:$0xff]   ;;  %v4271_v20 = vld [vmem:[#allocation5 + $0x40] ss:$16 sps:$4 sm:$0xff]  }
  0x54   :  { %328 = vmatpush1.bf16.msra.mxu0 %v4253_v8  ;;  %369 = vmatpush1.bf16.msra.mxu1 %v4254_v9  ;;  %v4272_v21 = vld [vmem:[#allocation5 + $0x48] ss:$16 sps:$4 sm:$0xff]   ;;  %v4273_v22 = vld [vmem:[#allocation5 + $0x24] ss:$16 sps:$4 sm:$0xff]   ;;  %v4275_v23 = vld [vmem:[#allocation5 + $0x2c] ss:$16 sps:$4 sm:$0xff]  }
  0x55   :  { %329 = vmatprep.subr.bf16.mxu0 %v4255_v10  ;;  %370 = vmatprep.subr.bf16.mxu1 %v4257_v11  ;;  %v4277_v24 = vld [vmem:[#allocation5 + $0x20] ss:$16 sps:$4 sm:$0xff]   ;;  %v4278_v25 = vld [vmem:[#allocation5 + $0x28] ss:$16 sps:$4 sm:$0xff]   ;;  %v4279_v26 = vld [vmem:[#allocation5 + $0x4] ss:$16 sps:$4 sm:$0xff]  }
  0x56   :  { %v4281_v27 = vld [vmem:[#allocation5 + $0xc] ss:$16 sps:$4 sm:$0xff]   ;;  %v4283_v28 = vld [vmem:[#allocation5] ss:$16 sps:$4 sm:$0xff]   ;;  %v4284_v29 = vld [vmem:[#allocation5 + $0x8] ss:$16 sps:$4 sm:$0xff]  }
  0x57   :  { %v4287_v31 = vld [vmem:[#allocation7 + $0xe4] ss:$16 sps:$4 sm:$0xff]   ;;  %v4285_v34 = vld [vmem:[#allocation7 + $0xe0] ss:$16 sps:$4 sm:$0xff]   ;;  %vm319_vm0 = vcmask 916480   ;;  %vm3729_vm1 = vcmask 7168  }
  0x58   :  { %330 = vmatpush1.bf16.msra.mxu0 %v4259_v12  ;;  %371 = vmatpush1.bf16.msra.mxu1 %v4260_v13  ;;  %v4290_v32 = vld [vmem:[#allocation7 + $0x2e4] ss:$16 sps:$4 sm:$0xff]   ;;  %v4288_v35 = vld [vmem:[#allocation7 + $0x2e0] ss:$16 sps:$4 sm:$0xff]  }
  0x59   :  { %331 = vmatprep.subr.bf16.mxu0 %v4261_v14  ;;  %372 = vmatprep.subr.bf16.mxu1 %v4263_v15  ;;  %v4293_v36 = vld [vmem:[#allocation7 + $0xc4] ss:$16 sps:$4 sm:$0xff]   ;;  %v4291_v38 = vld [vmem:[#allocation7 + $0xc0] ss:$16 sps:$4 sm:$0xff]  }
  0x5a   :  { %v4296_v37 = vld [vmem:[#allocation7 + $0x2c4] ss:$16 sps:$4 sm:$0xff]   ;;  %v4294_v39 = vld [vmem:[#allocation7 + $0x2c0] ss:$16 sps:$4 sm:$0xff]  }
  0x5b   :  { %v4299_v40 = vld [vmem:[#allocation7 + $0xa4] ss:$16 sps:$4 sm:$0xff]   ;;  %v4297_v42 = vld [vmem:[#allocation7 + $0xa0] ss:$16 sps:$4 sm:$0xff]  }
  0x5c   :  { %332 = vmatpush1.bf16.msra.mxu0 %v4265_v16  ;;  %373 = vmatpush1.bf16.msra.mxu1 %v4266_v17  ;;  %v4302_v41 = vld [vmem:[#allocation7 + $0x2a4] ss:$16 sps:$4 sm:$0xff]   ;;  %v4300_v43 = vld [vmem:[#allocation7 + $0x2a0] ss:$16 sps:$4 sm:$0xff]  }
  0x5d   :  { %333 = vmatprep.subr.bf16.mxu0 %v4267_v18  ;;  %374 = vmatprep.subr.bf16.mxu1 %v4269_v19  ;;  %v4305_v44 = vld [vmem:[#allocation7 + $0x84] ss:$16 sps:$4 sm:$0xff]   ;;  %v4303_v46 = vld [vmem:[#allocation7 + $0x80] ss:$16 sps:$4 sm:$0xff]  }
  0x5e   :  { %v4308_v45 = vld [vmem:[#allocation7 + $0x284] ss:$16 sps:$4 sm:$0xff]   ;;  %v4306_v47 = vld [vmem:[#allocation7 + $0x280] ss:$16 sps:$4 sm:$0xff]  }
  0x5f   :  { %v4311_v48 = vld [vmem:[#allocation7 + $0x64] ss:$16 sps:$4 sm:$0xff]   ;;  %v4309_v50 = vld [vmem:[#allocation7 + $0x60] ss:$16 sps:$4 sm:$0xff]  }
  0x60   :  { %334 = vmatpush1.bf16.msra.mxu0 %v4271_v20  ;;  %375 = vmatpush1.bf16.msra.mxu1 %v4272_v21  ;;  %v4314_v49 = vld [vmem:[#allocation7 + $0x264] ss:$16 sps:$4 sm:$0xff]   ;;  %v4312_v51 = vld [vmem:[#allocation7 + $0x260] ss:$16 sps:$4 sm:$0xff]  }
  0x61   :  { %335 = vmatprep.subr.bf16.mxu0 %v4273_v22  ;;  %376 = vmatprep.subr.bf16.mxu1 %v4275_v23  ;;  %v4317_v52 = vld [vmem:[#allocation7 + $0x44] ss:$16 sps:$4 sm:$0xff]   ;;  %v4315_v54 = vld [vmem:[#allocation7 + $0x40] ss:$16 sps:$4 sm:$0xff]  }
  0x62   :  { %v4320_v53 = vld [vmem:[#allocation7 + $0x244] ss:$16 sps:$4 sm:$0xff]   ;;  %v4318_v55 = vld [vmem:[#allocation7 + $0x240] ss:$16 sps:$4 sm:$0xff]  }
  0x63   :  { %v4323_v56 = vld [vmem:[#allocation7 + $0x24] ss:$16 sps:$4 sm:$0xff]   ;;  %v4321_v58 = vld [vmem:[#allocation7 + $0x20] ss:$16 sps:$4 sm:$0xff]  }
  0x64   :  { %336 = vmatpush1.bf16.msra.mxu0 %v4277_v24  ;;  %377 = vmatpush1.bf16.msra.mxu1 %v4278_v25  ;;  %v4326_v57 = vld [vmem:[#allocation7 + $0x224] ss:$16 sps:$4 sm:$0xff]   ;;  %v4324_v59 = vld [vmem:[#allocation7 + $0x220] ss:$16 sps:$4 sm:$0xff]  }
  0x65   :  { %337 = vmatprep.subr.bf16.mxu0 %v4279_v26  ;;  %378 = vmatprep.subr.bf16.mxu1 %v4281_v27  ;;  %v4329_v60 = vld [vmem:[#allocation7 + $0x4] ss:$16 sps:$4 sm:$0xff]   ;;  %v4327_v62 = vld [vmem:[#allocation7] ss:$16 sps:$4 sm:$0xff]  }
  0x66   :  { %v4332_v61 = vld [vmem:[#allocation7 + $0x204] ss:$16 sps:$4 sm:$0xff]   ;;  %v4330_v63 = vld [vmem:[#allocation7 + $0x200] ss:$16 sps:$4 sm:$0xff]  }
  0x67   :  { %v4335_v0 = vld [vmem:[#allocation7 + $0x1e4] ss:$16 sps:$4 sm:$0xff]   ;;  %v4333_v2 = vld [vmem:[#allocation7 + $0x1e0] ss:$16 sps:$4 sm:$0xff]  }
  0x68   :  { %338 = vmatpush1.bf16.msra.mxu0 %v4283_v28  ;;  %379 = vmatpush1.bf16.msra.mxu1 %v4284_v29  ;;  %v4338_v1 = vld [vmem:[#allocation7 + $0x3e4] ss:$16 sps:$4 sm:$0xff]   ;;  %v4336_v3 = vld [vmem:[#allocation7 + $0x3e0] ss:$16 sps:$4 sm:$0xff]  }
  0x69   :  { %1219 = vmatprep.subr.bf16.mxu0 %v4287_v31  ;;  %1260 = vmatprep.subr.bf16.mxu1 %v4290_v32  ;;  %v4341_v4 = vld [vmem:[#allocation7 + $0x1c4] ss:$16 sps:$4 sm:$0xff]   ;;  %v4339_v6 = vld [vmem:[#allocation7 + $0x1c0] ss:$16 sps:$4 sm:$0xff]   ;;  %v4383_v32 = vld [vmem:[#allocation7 + $0xec] ss:$16 sps:$4 sm:$0xff]  }
  0x6a   :  { %v4344_v5 = vld [vmem:[#allocation7 + $0x3c4] ss:$16 sps:$4 sm:$0xff]   ;;  %v4342_v7 = vld [vmem:[#allocation7 + $0x3c0] ss:$16 sps:$4 sm:$0xff]  }
  0x6b   :  { %3767 = vmatmul.mubr.msk.bf16.vlgmr.msra.gmra.mxu0 %vm319_vm0, %v128_v33  ;;  %3768 = vmatmul.mubr.msk.bf16.vlgmr.msra.gmra.mxu1 %vm319_vm0, %v128_v33  ;;  %v4347_v8 = vld [vmem:[#allocation7 + $0x1a4] ss:$16 sps:$4 sm:$0xff]   ;;  %v4345_v10 = vld [vmem:[#allocation7 + $0x1a0] ss:$16 sps:$4 sm:$0xff]   ;;  %v4386_v33 = vld [vmem:[#allocation7 + $0x2ec] ss:$16 sps:$4 sm:$0xff]  }
  0x6c   :  { %1220 = vmatpush1.bf16.msra.mxu0 %v4285_v34  ;;  %1261 = vmatpush1.bf16.msra.mxu1 %v4288_v35  ;;  %v4350_v9 = vld [vmem:[#allocation7 + $0x3a4] ss:$16 sps:$4 sm:$0xff]   ;;  %v4348_v11 = vld [vmem:[#allocation7 + $0x3a0] ss:$16 sps:$4 sm:$0xff]   ;;  %v159_v34 = vlaneseq }
  0x6d   :  { %1221 = vmatprep.subr.bf16.mxu0 %v4293_v36  ;;  %1262 = vmatprep.subr.bf16.mxu1 %v4296_v37  ;;  %v4353_v12 = vld [vmem:[#allocation7 + $0x184] ss:$16 sps:$4 sm:$0xff]   ;;  %v4351_v14 = vld [vmem:[#allocation7 + $0x180] ss:$16 sps:$4 sm:$0xff]  }
  0x6e   :  { %v4356_v13 = vld [vmem:[#allocation7 + $0x384] ss:$16 sps:$4 sm:$0xff]   ;;  %v4354_v15 = vld [vmem:[#allocation7 + $0x380] ss:$16 sps:$4 sm:$0xff]   ;;  %v160_v35 = vshrl.u32 %v159_v34, 7 }
  0x6f   :  { %v4359_v16 = vld [vmem:[#allocation7 + $0x164] ss:$16 sps:$4 sm:$0xff]   ;;  %v4357_v18 = vld [vmem:[#allocation7 + $0x160] ss:$16 sps:$4 sm:$0xff]   ;;  %v4408_v34 = vld [vmem:[#allocation7 + $0x268] ss:$16 sps:$4 sm:$0xff]  }
  0x70   :  { %1222 = vmatpush1.bf16.msra.mxu0 %v4291_v38  ;;  %1263 = vmatpush1.bf16.msra.mxu1 %v4294_v39  ;;  %v4362_v17 = vld [vmem:[#allocation7 + $0x364] ss:$16 sps:$4 sm:$0xff]   ;;  %v4360_v19 = vld [vmem:[#allocation7 + $0x360] ss:$16 sps:$4 sm:$0xff]   ;;  %v5169_v36 = vsub.s32 0, %v160_v35  ;;  %v5171_v37 = vsub.s32 2, %v160_v35 }
  0x71   :  { %1223 = vmatprep.subr.bf16.mxu0 %v4299_v40  ;;  %1264 = vmatprep.subr.bf16.mxu1 %v4302_v41  ;;  %v4365_v20 = vld [vmem:[#allocation7 + $0x144] ss:$16 sps:$4 sm:$0xff]   ;;  %v4363_v22 = vld [vmem:[#allocation7 + $0x140] ss:$16 sps:$4 sm:$0xff]   ;;  %v5176_v39 = vsub.s32 1, %v160_v35  ;;  %v5178_v40 = vsub.s32 3, %v160_v35 }
  0x72   :  { %v4368_v21 = vld [vmem:[#allocation7 + $0x344] ss:$16 sps:$4 sm:$0xff]   ;;  %v4366_v23 = vld [vmem:[#allocation7 + $0x340] ss:$16 sps:$4 sm:$0xff]   ;;  %v4413_v35 = vld [vmem:[#allocation7 + $0x4c] ss:$16 sps:$4 sm:$0xff]  }
  0x73   :  { %v4371_v24 = vld [vmem:[#allocation7 + $0x124] ss:$16 sps:$4 sm:$0xff]   ;;  %v4369_v26 = vld [vmem:[#allocation7 + $0x120] ss:$16 sps:$4 sm:$0xff]  }
  0x74   :  { %1224 = vmatpush1.bf16.msra.mxu0 %v4297_v42  ;;  %1265 = vmatpush1.bf16.msra.mxu1 %v4300_v43  ;;  %v4374_v25 = vld [vmem:[#allocation7 + $0x324] ss:$16 sps:$4 sm:$0xff]   ;;  %v4372_v27 = vld [vmem:[#allocation7 + $0x320] ss:$16 sps:$4 sm:$0xff]  }
  0x75   :  { %1225 = vmatprep.subr.bf16.mxu0 %v4305_v44  ;;  %1266 = vmatprep.subr.bf16.mxu1 %v4308_v45  ;;  %v4377_v28 = vld [vmem:[#allocation7 + $0x104] ss:$16 sps:$4 sm:$0xff]   ;;  %v4375_v30 = vld [vmem:[#allocation7 + $0x100] ss:$16 sps:$4 sm:$0xff]  }
  0x76   :  { %v4380_v29 = vld [vmem:[#allocation7 + $0x304] ss:$16 sps:$4 sm:$0xff]   ;;  %v4378_v31 = vld [vmem:[#allocation7 + $0x300] ss:$16 sps:$4 sm:$0xff]  }
  0x77   :  { %v157_v38 = vld [vmem:[%s5258_s2] sm:$0xf] }
  0x78   :  { %1226 = vmatpush1.bf16.msra.mxu0 %v4303_v46  ;;  %1267 = vmatpush1.bf16.msra.mxu1 %v4306_v47  ;;  %v162_v41 = vrot.slane %v157_v38, %v5169_v36  ;;  %v170_v42 = vrot.slane %v157_v38, %v5171_v37  ;;  %v166_v45 = vrot.slane %v157_v38, %v5176_v39 }
  0x79   :  { %1227 = vmatprep.subr.bf16.mxu0 %v4311_v48  ;;  %1268 = vmatprep.subr.bf16.mxu1 %v4314_v49  ;;  %v174_v46 = vrot.slane %v157_v38, %v5178_v40  ;;  %v4416_v38 = vld [vmem:[#allocation7 + $0x24c] ss:$16 sps:$4 sm:$0xff]  }
  0x7c   :  { %1228 = vmatpush1.bf16.msra.mxu0 %v4309_v50  ;;  %1269 = vmatpush1.bf16.msra.mxu1 %v4312_v51 }
  0x7d   :  { %1229 = vmatprep.subr.bf16.mxu0 %v4317_v52  ;;  %1270 = vmatprep.subr.bf16.mxu1 %v4320_v53 }
  0x80   :  { %1230 = vmatpush1.bf16.msra.mxu0 %v4315_v54  ;;  %1271 = vmatpush1.bf16.msra.mxu1 %v4318_v55 }
  0x81   :  { %1231 = vmatprep.subr.bf16.mxu0 %v4323_v56  ;;  %1272 = vmatprep.subr.bf16.mxu1 %v4326_v57 }
  0x84   :  { %1232 = vmatpush1.bf16.msra.mxu0 %v4321_v58  ;;  %1273 = vmatpush1.bf16.msra.mxu1 %v4324_v59 }
  0x85   :  { %1233 = vmatprep.subr.bf16.mxu0 %v4329_v60  ;;  %1274 = vmatprep.subr.bf16.mxu1 %v4332_v61 }
  0x88   :  { %1234 = vmatpush1.bf16.msra.mxu0 %v4327_v62  ;;  %1275 = vmatpush1.bf16.msra.mxu1 %v4330_v63 }
  0x89   :  { %1235 = vmatprep.subr.bf16.mxu0 %v4335_v0  ;;  %1276 = vmatprep.subr.bf16.mxu1 %v4338_v1 }
  0x8c   :  { %1236 = vmatpush2.bf16.msra.mxu0 %v4333_v2  ;;  %1277 = vmatpush2.bf16.msra.mxu1 %v4336_v3 }
  0x8d   :  { %1237 = vmatprep.subr.bf16.mxu0 %v4341_v4  ;;  %1278 = vmatprep.subr.bf16.mxu1 %v4344_v5 }
  0x90   :  { %1238 = vmatpush2.bf16.msra.mxu0 %v4339_v6  ;;  %1279 = vmatpush2.bf16.msra.mxu1 %v4342_v7 }
  0x91   :  { %1239 = vmatprep.subr.bf16.mxu0 %v4347_v8  ;;  %1280 = vmatprep.subr.bf16.mxu1 %v4350_v9 }
  0x94   :  { %1240 = vmatpush2.bf16.msra.mxu0 %v4345_v10  ;;  %1281 = vmatpush2.bf16.msra.mxu1 %v4348_v11 }
  0x95   :  { %1241 = vmatprep.subr.bf16.mxu0 %v4353_v12  ;;  %1282 = vmatprep.subr.bf16.mxu1 %v4356_v13 }
  0x98   :  { %1242 = vmatpush2.bf16.msra.mxu0 %v4351_v14  ;;  %1283 = vmatpush2.bf16.msra.mxu1 %v4354_v15  ;;  %v4381_v14 = vld [vmem:[#allocation7 + $0xe8] ss:$16 sps:$4 sm:$0xff]  }
  0x99   :  { %1243 = vmatprep.subr.bf16.mxu0 %v4359_v16  ;;  %1284 = vmatprep.subr.bf16.mxu1 %v4362_v17  ;;  %v4384_v17 = vld [vmem:[#allocation7 + $0x2e8] ss:$16 sps:$4 sm:$0xff]  }
  0x9c   :  { %1244 = vmatpush2.bf16.msra.mxu0 %v4357_v18  ;;  %1285 = vmatpush2.bf16.msra.mxu1 %v4360_v19  ;;  %v4389_v19 = vld [vmem:[#allocation7 + $0xcc] ss:$16 sps:$4 sm:$0xff]  }
  0x9d   :  { %1245 = vmatprep.subr.bf16.mxu0 %v4365_v20  ;;  %1286 = vmatprep.subr.bf16.mxu1 %v4368_v21  ;;  %v4392_v20 = vld [vmem:[#allocation7 + $0x2cc] ss:$16 sps:$4 sm:$0xff]   ;;  %v4387_v21 = vld [vmem:[#allocation7 + $0xc8] ss:$16 sps:$4 sm:$0xff]  }
  0xa0   :  { %1246 = vmatpush2.bf16.msra.mxu0 %v4363_v22  ;;  %1287 = vmatpush2.bf16.msra.mxu1 %v4366_v23  ;;  %v4390_v22 = vld [vmem:[#allocation7 + $0x2c8] ss:$16 sps:$4 sm:$0xff]   ;;  %v4395_v23 = vld [vmem:[#allocation7 + $0xac] ss:$16 sps:$4 sm:$0xff]  }
  0xa1   :  { %1247 = vmatprep.subr.bf16.mxu0 %v4371_v24  ;;  %1288 = vmatprep.subr.bf16.mxu1 %v4374_v25  ;;  %v4398_v24 = vld [vmem:[#allocation7 + $0x2ac] ss:$16 sps:$4 sm:$0xff]   ;;  %v4393_v25 = vld [vmem:[#allocation7 + $0xa8] ss:$16 sps:$4 sm:$0xff]  }
  0xa4   :  { %1248 = vmatpush2.bf16.msra.mxu0 %v4369_v26  ;;  %1289 = vmatpush2.bf16.msra.mxu1 %v4372_v27  ;;  %v4396_v26 = vld [vmem:[#allocation7 + $0x2a8] ss:$16 sps:$4 sm:$0xff]   ;;  %v4401_v27 = vld [vmem:[#allocation7 + $0x8c] ss:$16 sps:$4 sm:$0xff]  }
  0xa5   :  { %1249 = vmatprep.subr.bf16.mxu0 %v4377_v28  ;;  %1290 = vmatprep.subr.bf16.mxu1 %v4380_v29  ;;  %v4404_v28 = vld [vmem:[#allocation7 + $0x28c] ss:$16 sps:$4 sm:$0xff]   ;;  %v4399_v29 = vld [vmem:[#allocation7 + $0x88] ss:$16 sps:$4 sm:$0xff]  }
  0xa8   :  { %1250 = vmatpush2.bf16.msra.mxu0 %v4375_v30  ;;  %1291 = vmatpush2.bf16.msra.mxu1 %v4378_v31  ;;  %v4402_v30 = vld [vmem:[#allocation7 + $0x288] ss:$16 sps:$4 sm:$0xff]   ;;  %v4407_v31 = vld [vmem:[#allocation7 + $0x6c] ss:$16 sps:$4 sm:$0xff]  }
  0xa9   :  { %1301 = vmatprep.subr.bf16.mxu0 %v4383_v32  ;;  %1342 = vmatprep.subr.bf16.mxu1 %v4386_v33  ;;  %v4410_v32 = vld [vmem:[#allocation7 + $0x26c] ss:$16 sps:$4 sm:$0xff]   ;;  %v4405_v33 = vld [vmem:[#allocation7 + $0x68] ss:$16 sps:$4 sm:$0xff]  }
 0x12b   :  { %v357_v43 = vpop.f32.mrf.mxu0  ;;  %v398_v44 = vpop.f32.mrf.mxu1 }
 0x12c   :  { %v358_v47 = vadd.f32 %v357_v43, %v162_v41  ;;  %v399_v48 = vadd.f32 %v398_v44, %v170_v42  ;;  %v4411_v41 = vld [vmem:[#allocation7 + $0x48] ss:$16 sps:$4 sm:$0xff]   ;;  %v4419_v43 = vld [vmem:[#allocation7 + $0x2c] ss:$16 sps:$4 sm:$0xff]  }
 0x12d   :  { %v359_v49 = vpop.f32.mrf.mxu0  ;;  %v400_v50 = vpop.f32.mrf.mxu1  ;;  %v4414_v42 = vld [vmem:[#allocation7 + $0x248] ss:$16 sps:$4 sm:$0xff]   ;;  %v4422_v44 = vld [vmem:[#allocation7 + $0x22c] ss:$16 sps:$4 sm:$0xff]  }
 0x12e   :  { %v409_v51 = vmul.f32 0.70710677, %v358_v47  ;;  %v411_v52 = vmul.f32 0.70710677, %v399_v48  ;;  %v360_v53 = vadd.f32 %v359_v49, %v166_v45  ;;  %v401_v54 = vadd.f32 %v400_v50, %v174_v46  ;;  %v4417_v45 = vld [vmem:[#allocation7 + $0x28] ss:$16 sps:$4 sm:$0xff]  }
 0x12f   :  { %v361_v55 = vpop.f32.mrf.mxu0  ;;  %v402_v56 = vpop.f32.mrf.mxu1  ;;  %v405_v2 = vmul.f32 0.5, %v358_v47  ;;  %v407_v4 = vmul.f32 0.5, %v399_v48  ;;  %v4420_v46 = vld [vmem:[#allocation7 + $0x228] ss:$16 sps:$4 sm:$0xff]   ;;  %v4425_v47 = vld [vmem:[#allocation7 + $0xc] ss:$16 sps:$4 sm:$0xff]  }
 0x130   :  { %4893 = verf.f32 %v409_v51  ;;  %v410_v57 = vmul.f32 0.70710677, %v360_v53  ;;  %v412_v60 = vmul.f32 0.70710677, %v401_v54  ;;  %v406_v5 = vmul.f32 0.5, %v360_v53 }
 0x131   :  { %4895 = verf.f32 %v411_v52  ;;  %v362_v58 = vpop.f32.mrf.mxu0  ;;  %v403_v59 = vpop.f32.mrf.mxu1  ;;  %v408_v8 = vmul.f32 0.5, %v401_v54  ;;  %v4428_v48 = vld [vmem:[#allocation7 + $0x20c] ss:$16 sps:$4 sm:$0xff]   ;;  %v4423_v49 = vld [vmem:[#allocation7 + $0x8] ss:$16 sps:$4 sm:$0xff]  }
 0x132   :  { %4897 = verf.f32 %v410_v57  ;;  %v4426_v50 = vld [vmem:[#allocation7 + $0x208] ss:$16 sps:$4 sm:$0xff]   ;;  %v4431_v51 = vld [vmem:[#allocation7 + $0x1ec] ss:$16 sps:$4 sm:$0xff]  }
 0x133   :  { %4899 = verf.f32 %v412_v60  ;;  %v4434_v52 = vld [vmem:[#allocation7 + $0x3ec] ss:$16 sps:$4 sm:$0xff]   ;;  %v4429_v53 = vld [vmem:[#allocation7 + $0x1e8] ss:$16 sps:$4 sm:$0xff]  }
 0x134   :  { %v4432_v54 = vld [vmem:[#allocation7 + $0x3e8] ss:$16 sps:$4 sm:$0xff]   ;;  %v4437_v55 = vld [vmem:[#allocation7 + $0x1cc] ss:$16 sps:$4 sm:$0xff]  }
 0x135   :  { %v4440_v56 = vld [vmem:[#allocation7 + $0x3cc] ss:$16 sps:$4 sm:$0xff]   ;;  %v4435_v57 = vld [vmem:[#allocation7 + $0x1c8] ss:$16 sps:$4 sm:$0xff]  }
 0x136   :  { %v4438_v58 = vld [vmem:[#allocation7 + $0x3c8] ss:$16 sps:$4 sm:$0xff]   ;;  %v4443_v59 = vld [vmem:[#allocation7 + $0x1ac] ss:$16 sps:$4 sm:$0xff]  }
 0x137   :  { %v4446_v60 = vld [vmem:[#allocation7 + $0x3ac] ss:$16 sps:$4 sm:$0xff]  }
 0x13d   :  { %v4894_v61 = vpop.eup %4893 }
 0x13e   :  { %v4896_v62 = vpop.eup %4895  ;;  %v417_v63 = vadd.f32 1.0, %v4894_v61  ;;  %v4441_v61 = vld [vmem:[#allocation7 + $0x1a8] ss:$16 sps:$4 sm:$0xff]  }
 0x13f   :  { %v419_v0 = vadd.f32 1.0, %v4896_v62  ;;  %v4898_v1 = vpop.eup %4897  ;;  %v4444_v62 = vld [vmem:[#allocation7 + $0x3a8] ss:$16 sps:$4 sm:$0xff]  }
 0x140   :  { %v4900_v3 = vpop.eup %4899  ;;  %v418_v6 = vadd.f32 1.0, %v4898_v1  ;;  %v421_v7 = vmul.f32 %v417_v63, %v405_v2  ;;  %v4449_v63 = vld [vmem:[#allocation7 + $0x18c] ss:$16 sps:$4 sm:$0xff]   ;;  %v4447_v1 = vld [vmem:[#allocation7 + $0x188] ss:$16 sps:$4 sm:$0xff]  }
 0x141   :  { %v420_v9 = vadd.f32 1.0, %v4900_v3  ;;  %v423_v10 = vmul.f32 %v419_v0, %v407_v4  ;;  %v4452_v0 = vld [vmem:[#allocation7 + $0x38c] ss:$16 sps:$4 sm:$0xff]   ;;  %v4450_v2 = vld [vmem:[#allocation7 + $0x388] ss:$16 sps:$4 sm:$0xff]  }
 0x142   :  { %v422_v11 = vmul.f32 %v418_v6, %v406_v5  ;;  %v5184_v15 = vpack.c.bf16 %v421_v7, %v421_v7  ;;  %v4455_v3 = vld [vmem:[#allocation7 + $0x16c] ss:$16 sps:$4 sm:$0xff]   ;;  %v4453_v5 = vld [vmem:[#allocation7 + $0x168] ss:$16 sps:$4 sm:$0xff]  }
 0x143   :  { %v424_v12 = vmul.f32 %v420_v9, %v408_v8  ;;  %v5186_v18 = vpack.c.bf16 %v423_v10, %v423_v10  ;;  %v4458_v4 = vld [vmem:[#allocation7 + $0x36c] ss:$16 sps:$4 sm:$0xff]   ;;  %v4456_v6 = vld [vmem:[#allocation7 + $0x368] ss:$16 sps:$4 sm:$0xff]  }
 0x144   :  { %v426_v13 = vpack.c.bf16 %v422_v11, %v422_v11  ;;  %v4461_v7 = vld [vmem:[#allocation7 + $0x14c] ss:$16 sps:$4 sm:$0xff]   ;;  %v4459_v9 = vld [vmem:[#allocation7 + $0x148] ss:$16 sps:$4 sm:$0xff]  }
 0x145   :  { %v428_v16 = vpack.c.bf16 %v424_v12, %v424_v12  ;;  %v4464_v8 = vld [vmem:[#allocation7 + $0x34c] ss:$16 sps:$4 sm:$0xff]   ;;  %v4462_v10 = vld [vmem:[#allocation7 + $0x348] ss:$16 sps:$4 sm:$0xff]  }
 0x146   :  { %1251 = vmatprep.mubr.bf16.mxu0 %v426_v13  ;;  %v4467_v11 = vld [vmem:[#allocation7 + $0x12c] ss:$16 sps:$4 sm:$0xff]  }
 0x147   :  { %1292 = vmatprep.mubr.bf16.mxu1 %v428_v16  ;;  %1252 = vmatmul.mubr.bf16.vlgmr.msra.gmra.mxu0 %v5184_v15  ;;  %v4470_v12 = vld [vmem:[#allocation7 + $0x32c] ss:$16 sps:$4 sm:$0xff]  }
 0x148   :  { %1293 = vmatmul.mubr.bf16.vlgmr.msra.gmra.mxu1 %v5186_v18  ;;  %1302 = vmatpush1.bf16.msra.mxu0 %v4381_v14  ;;  %v4468_v14 = vld [vmem:[#allocation7 + $0x328] ss:$16 sps:$4 sm:$0xff]  }
 0x149   :  { %1343 = vmatpush1.bf16.msra.mxu1 %v4384_v17  ;;  %1333 = vmatprep.mubr.bf16.mxu0 %v426_v13  ;;  %v4465_v13 = vld [vmem:[#allocation7 + $0x128] ss:$16 sps:$4 sm:$0xff]   ;;  %v4476_v17 = vld [vmem:[#allocation7 + $0x30c] ss:$16 sps:$4 sm:$0xff]  }
 0x14a   :  { %1374 = vmatprep.mubr.bf16.mxu1 %v428_v16  ;;  %1303 = vmatprep.subr.bf16.mxu0 %v4389_v19  ;;  %v4473_v16 = vld [vmem:[#allocation7 + $0x10c] ss:$16 sps:$4 sm:$0xff]   ;;  %v4471_v19 = vld [vmem:[#allocation7 + $0x108] ss:$16 sps:$4 sm:$0xff]  }
 0x14b   :  { %1344 = vmatprep.subr.bf16.mxu1 %v4392_v20  ;;  %v4474_v20 = vld [vmem:[#allocation7 + $0x308] ss:$16 sps:$4 sm:$0xff]  }
 0x14c   :  { %1304 = vmatpush1.bf16.msra.mxu0 %v4387_v21  ;;  %v4479_v21 = vld [vmem:[#allocation8 + $0xe4] ss:$16 sps:$4 sm:$0xff]  }
 0x14d   :  { %1345 = vmatpush1.bf16.msra.mxu1 %v4390_v22  ;;  %1305 = vmatprep.subr.bf16.mxu0 %v4395_v23  ;;  %v4477_v22 = vld [vmem:[#allocation8 + $0xe0] ss:$16 sps:$4 sm:$0xff]   ;;  %v4482_v23 = vld [vmem:[#allocation8 + $0xc4] ss:$16 sps:$4 sm:$0xff]  }
 0x14e   :  { %1346 = vmatprep.subr.bf16.mxu1 %v4398_v24  ;;  %v4480_v24 = vld [vmem:[#allocation8 + $0xc0] ss:$16 sps:$4 sm:$0xff]  }
 0x150   :  { %1306 = vmatpush1.bf16.msra.mxu0 %v4393_v25  ;;  %v4485_v25 = vld [vmem:[#allocation8 + $0xa4] ss:$16 sps:$4 sm:$0xff]  }
 0x151   :  { %1347 = vmatpush1.bf16.msra.mxu1 %v4396_v26  ;;  %1307 = vmatprep.subr.bf16.mxu0 %v4401_v27  ;;  %v4483_v26 = vld [vmem:[#allocation8 + $0xa0] ss:$16 sps:$4 sm:$0xff]   ;;  %v4488_v27 = vld [vmem:[#allocation8 + $0x84] ss:$16 sps:$4 sm:$0xff]  }
 0x152   :  { %1348 = vmatprep.subr.bf16.mxu1 %v4404_v28  ;;  %v4486_v28 = vld [vmem:[#allocation8 + $0x80] ss:$16 sps:$4 sm:$0xff]  }
 0x154   :  { %1308 = vmatpush1.bf16.msra.mxu0 %v4399_v29  ;;  %v4491_v29 = vld [vmem:[#allocation8 + $0x64] ss:$16 sps:$4 sm:$0xff]  }
 0x155   :  { %1349 = vmatpush1.bf16.msra.mxu1 %v4402_v30  ;;  %1309 = vmatprep.subr.bf16.mxu0 %v4407_v31  ;;  %v4489_v30 = vld [vmem:[#allocation8 + $0x60] ss:$16 sps:$4 sm:$0xff]   ;;  %v4494_v31 = vld [vmem:[#allocation8 + $0x44] ss:$16 sps:$4 sm:$0xff]  }
 0x156   :  { %1350 = vmatprep.subr.bf16.mxu1 %v4410_v32  ;;  %v4495_v32 = vld [vmem:[#allocation8 + $0x20] ss:$16 sps:$4 sm:$0xff]  }
 0x158   :  { %1310 = vmatpush1.bf16.msra.mxu0 %v4405_v33  ;;  %v4500_v33 = vld [vmem:[#allocation8 + $0x4] ss:$16 sps:$4 sm:$0xff]  }
 0x159   :  { %1351 = vmatpush1.bf16.msra.mxu1 %v4408_v34  ;;  %1311 = vmatprep.subr.bf16.mxu0 %v4413_v35  ;;  %v4498_v34 = vld [vmem:[#allocation8] ss:$16 sps:$4 sm:$0xff]  }
 0x15a   :  { %1352 = vmatprep.subr.bf16.mxu1 %v4416_v38  ;;  %v4525_v35 = vld [vmem:[#allocation8 + $0x2e0] ss:$16 sps:$4 sm:$0xff]   ;;  %v4503_v38 = vld [vmem:[#allocation8 + $0x1e4] ss:$16 sps:$4 sm:$0xff]  }
 0x15c   :  { %1312 = vmatpush1.bf16.msra.mxu0 %v4411_v41  ;;  %v4527_v41 = vld [vmem:[#allocation8 + $0x2e4] ss:$16 sps:$4 sm:$0xff]  }
 0x15d   :  { %1353 = vmatpush1.bf16.msra.mxu1 %v4414_v42  ;;  %1313 = vmatprep.subr.bf16.mxu0 %v4419_v43  ;;  %v4501_v42 = vld [vmem:[#allocation8 + $0x1e0] ss:$16 sps:$4 sm:$0xff]   ;;  %v4506_v43 = vld [vmem:[#allocation8 + $0x1c4] ss:$16 sps:$4 sm:$0xff]  }
 0x15e   :  { %1354 = vmatprep.subr.bf16.mxu1 %v4422_v44  ;;  %v4531_v44 = vld [vmem:[#allocation8 + $0x2c0] ss:$16 sps:$4 sm:$0xff]  }
 0x160   :  { %1314 = vmatpush1.bf16.msra.mxu0 %v4417_v45  ;;  %v4533_v45 = vld [vmem:[#allocation8 + $0x2c4] ss:$16 sps:$4 sm:$0xff]  }
 0x161   :  { %1355 = vmatpush1.bf16.msra.mxu1 %v4420_v46  ;;  %1315 = vmatprep.subr.bf16.mxu0 %v4425_v47  ;;  %v4504_v46 = vld [vmem:[#allocation8 + $0x1c0] ss:$16 sps:$4 sm:$0xff]   ;;  %v4509_v47 = vld [vmem:[#allocation8 + $0x1a4] ss:$16 sps:$4 sm:$0xff]  }
 0x162   :  { %1356 = vmatprep.subr.bf16.mxu1 %v4428_v48  ;;  %v4537_v48 = vld [vmem:[#allocation8 + $0x2a0] ss:$16 sps:$4 sm:$0xff]  }
 0x164   :  { %1316 = vmatpush1.bf16.msra.mxu0 %v4423_v49  ;;  %v4539_v49 = vld [vmem:[#allocation8 + $0x2a4] ss:$16 sps:$4 sm:$0xff]  }
 0x165   :  { %1357 = vmatpush1.bf16.msra.mxu1 %v4426_v50  ;;  %1317 = vmatprep.subr.bf16.mxu0 %v4431_v51  ;;  %v4507_v50 = vld [vmem:[#allocation8 + $0x1a0] ss:$16 sps:$4 sm:$0xff]   ;;  %v4512_v51 = vld [vmem:[#allocation8 + $0x184] ss:$16 sps:$4 sm:$0xff]  }
 0x166   :  { %1358 = vmatprep.subr.bf16.mxu1 %v4434_v52  ;;  %v4543_v52 = vld [vmem:[#allocation8 + $0x280] ss:$16 sps:$4 sm:$0xff]  }
 0x168   :  { %1318 = vmatpush2.bf16.msra.mxu0 %v4429_v53  ;;  %v4545_v53 = vld [vmem:[#allocation8 + $0x284] ss:$16 sps:$4 sm:$0xff]  }
 0x169   :  { %1359 = vmatpush2.bf16.msra.mxu1 %v4432_v54  ;;  %1319 = vmatprep.subr.bf16.mxu0 %v4437_v55  ;;  %v4510_v54 = vld [vmem:[#allocation8 + $0x180] ss:$16 sps:$4 sm:$0xff]   ;;  %v4515_v55 = vld [vmem:[#allocation8 + $0x164] ss:$16 sps:$4 sm:$0xff]  }
 0x16a   :  { %1360 = vmatprep.subr.bf16.mxu1 %v4440_v56  ;;  %v4549_v56 = vld [vmem:[#allocation8 + $0x260] ss:$16 sps:$4 sm:$0xff]  }
 0x16c   :  { %1320 = vmatpush2.bf16.msra.mxu0 %v4435_v57  ;;  %v4551_v57 = vld [vmem:[#allocation8 + $0x264] ss:$16 sps:$4 sm:$0xff]  }
 0x16d   :  { %1361 = vmatpush2.bf16.msra.mxu1 %v4438_v58  ;;  %1321 = vmatprep.subr.bf16.mxu0 %v4443_v59  ;;  %v4513_v58 = vld [vmem:[#allocation8 + $0x160] ss:$16 sps:$4 sm:$0xff]   ;;  %v4518_v59 = vld [vmem:[#allocation8 + $0x144] ss:$16 sps:$4 sm:$0xff]  }
 0x16e   :  { %1362 = vmatprep.subr.bf16.mxu1 %v4446_v60  ;;  %v4555_v60 = vld [vmem:[#allocation8 + $0x240] ss:$16 sps:$4 sm:$0xff]  }
 0x170   :  { %1322 = vmatpush2.bf16.msra.mxu0 %v4441_v61  ;;  %v4557_v61 = vld [vmem:[#allocation8 + $0x244] ss:$16 sps:$4 sm:$0xff]  }
 0x171   :  { %1363 = vmatpush2.bf16.msra.mxu1 %v4444_v62  ;;  %1323 = vmatprep.subr.bf16.mxu0 %v4449_v63  ;;  %v4516_v62 = vld [vmem:[#allocation8 + $0x140] ss:$16 sps:$4 sm:$0xff]   ;;  %v4521_v63 = vld [vmem:[#allocation8 + $0x124] ss:$16 sps:$4 sm:$0xff]  }
 0x172   :  { %1364 = vmatprep.subr.bf16.mxu1 %v4452_v0  ;;  %v4561_v0 = vld [vmem:[#allocation8 + $0x220] ss:$16 sps:$4 sm:$0xff]  }
 0x174   :  { %1324 = vmatpush2.bf16.msra.mxu0 %v4447_v1  ;;  %v4563_v1 = vld [vmem:[#allocation8 + $0x224] ss:$16 sps:$4 sm:$0xff]  }
 0x175   :  { %1365 = vmatpush2.bf16.msra.mxu1 %v4450_v2  ;;  %1325 = vmatprep.subr.bf16.mxu0 %v4455_v3  ;;  %v4519_v2 = vld [vmem:[#allocation8 + $0x120] ss:$16 sps:$4 sm:$0xff]   ;;  %v4524_v3 = vld [vmem:[#allocation8 + $0x104] ss:$16 sps:$4 sm:$0xff]  }
 0x176   :  { %1366 = vmatprep.subr.bf16.mxu1 %v4458_v4  ;;  %v4567_v4 = vld [vmem:[#allocation8 + $0x200] ss:$16 sps:$4 sm:$0xff]  }
 0x178   :  { %1326 = vmatpush2.bf16.msra.mxu0 %v4453_v5  ;;  %v4569_v5 = vld [vmem:[#allocation8 + $0x204] ss:$16 sps:$4 sm:$0xff]  }
 0x179   :  { %1367 = vmatpush2.bf16.msra.mxu1 %v4456_v6  ;;  %1327 = vmatprep.subr.bf16.mxu0 %v4461_v7  ;;  %v4522_v6 = vld [vmem:[#allocation8 + $0x100] ss:$16 sps:$4 sm:$0xff]   ;;  %v4530_v7 = vld [vmem:[#allocation8 + $0xec] ss:$16 sps:$4 sm:$0xff]  }
 0x17a   :  { %1368 = vmatprep.subr.bf16.mxu1 %v4464_v8  ;;  %v4573_v8 = vld [vmem:[#allocation8 + $0x3e0] ss:$16 sps:$4 sm:$0xff]  }
 0x17c   :  { %1328 = vmatpush2.bf16.msra.mxu0 %v4459_v9  ;;  %v4575_v9 = vld [vmem:[#allocation8 + $0x3e4] ss:$16 sps:$4 sm:$0xff]  }
 0x17d   :  { %1369 = vmatpush2.bf16.msra.mxu1 %v4462_v10  ;;  %1329 = vmatprep.subr.bf16.mxu0 %v4467_v11  ;;  %v4581_v10 = vld [vmem:[#allocation8 + $0x3c4] ss:$16 sps:$4 sm:$0xff]   ;;  %v4579_v11 = vld [vmem:[#allocation8 + $0x3c0] ss:$16 sps:$4 sm:$0xff]  }
 0x17e   :  { %1370 = vmatprep.subr.bf16.mxu1 %v4470_v12  ;;  %v4587_v12 = vld [vmem:[#allocation8 + $0x3a4] ss:$16 sps:$4 sm:$0xff]  }
 0x180   :  { %1330 = vmatpush2.bf16.msra.mxu0 %v4465_v13  ;;  %v4585_v13 = vld [vmem:[#allocation8 + $0x3a0] ss:$16 sps:$4 sm:$0xff]  }
 0x181   :  { %1371 = vmatpush2.bf16.msra.mxu1 %v4468_v14  ;;  %1331 = vmatprep.subr.bf16.mxu0 %v4473_v16  ;;  %v4593_v14 = vld [vmem:[#allocation8 + $0x384] ss:$16 sps:$4 sm:$0xff]   ;;  %v4591_v16 = vld [vmem:[#allocation8 + $0x380] ss:$16 sps:$4 sm:$0xff]  }
 0x182   :  { %1372 = vmatprep.subr.bf16.mxu1 %v4476_v17  ;;  %v4599_v17 = vld [vmem:[#allocation8 + $0x364] ss:$16 sps:$4 sm:$0xff]  }
 0x184   :  { %1332 = vmatpush2.bf16.msra.mxu0 %v4471_v19  ;;  %v4597_v19 = vld [vmem:[#allocation8 + $0x360] ss:$16 sps:$4 sm:$0xff]  }
 0x185   :  { %1373 = vmatpush2.bf16.msra.mxu1 %v4474_v20  ;;  %2197 = vmatprep.subr.bf16.mxu0 %v4479_v21  ;;  %v4605_v20 = vld [vmem:[#allocation8 + $0x344] ss:$16 sps:$4 sm:$0xff]   ;;  %v4603_v21 = vld [vmem:[#allocation8 + $0x340] ss:$16 sps:$4 sm:$0xff]  }
 0x186   :  { %2238 = vmatprep.subr.bf16.mxu1 %v4527_v41 }
 0x187   :  { %1334 = vmatmul.mubr.bf16.vlgmr.msra.gmra.mxu0 %v5184_v15  ;;  %v4492_v15 = vld [vmem:[#allocation8 + $0x40] ss:$16 sps:$4 sm:$0xff]  }
 0x188   :  { %1375 = vmatmul.mubr.bf16.vlgmr.msra.gmra.mxu1 %v5186_v18  ;;  %2198 = vmatpush1.bf16.msra.mxu0 %v4477_v22  ;;  %v4497_v18 = vld [vmem:[#allocation8 + $0x24] ss:$16 sps:$4 sm:$0xff]  }
 0x189   :  { %2199 = vmatprep.subr.bf16.mxu0 %v4482_v23  ;;  %2239 = vmatpush1.bf16.msra.mxu1 %v4525_v35  ;;  %v4611_v22 = vld [vmem:[#allocation8 + $0x324] ss:$16 sps:$4 sm:$0xff]   ;;  %v4609_v23 = vld [vmem:[#allocation8 + $0x320] ss:$16 sps:$4 sm:$0xff]  }
 0x18a   :  { %2240 = vmatprep.subr.bf16.mxu1 %v4533_v45 }
 0x18c   :  { %2200 = vmatpush1.bf16.msra.mxu0 %v4480_v24  ;;  %v4617_v24 = vld [vmem:[#allocation8 + $0x304] ss:$16 sps:$4 sm:$0xff]  }
 0x18d   :  { %2201 = vmatprep.subr.bf16.mxu0 %v4485_v25  ;;  %2241 = vmatpush1.bf16.msra.mxu1 %v4531_v44  ;;  %v4615_v25 = vld [vmem:[#allocation8 + $0x300] ss:$16 sps:$4 sm:$0xff]  }
 0x18e   :  { %2242 = vmatprep.subr.bf16.mxu1 %v4539_v49 }
 0x190   :  { %2202 = vmatpush1.bf16.msra.mxu0 %v4483_v26  ;;  %v4623_v26 = vld [vmem:[#allocation8 + $0x2ec] ss:$16 sps:$4 sm:$0xff]  }
 0x191   :  { %2203 = vmatprep.subr.bf16.mxu0 %v4488_v27  ;;  %2243 = vmatpush1.bf16.msra.mxu1 %v4537_v48  ;;  %v5195_v27 = vld [vmem:[%s5260_s4] sm:$0xf] }
 0x192   :  { %2244 = vmatprep.subr.bf16.mxu1 %v4545_v53 }
 0x194   :  { %2204 = vmatpush1.bf16.msra.mxu0 %v4486_v28  ;;  %v562_v28 = vrot.slane %v5195_v27, %v5169_v36 }
 0x195   :  { %2205 = vmatprep.subr.bf16.mxu0 %v4491_v29  ;;  %2245 = vmatpush1.bf16.msra.mxu1 %v4543_v52  ;;  %v566_v29 = vrot.slane %v5195_v27, %v5176_v39 }
 0x196   :  { %2246 = vmatprep.subr.bf16.mxu1 %v4551_v57  ;;  %v4536_v57 = vld [vmem:[#allocation8 + $0xcc] ss:$16 sps:$4 sm:$0xff]  }
 0x198   :  { %2206 = vmatpush1.bf16.msra.mxu0 %v4489_v30 }
 0x199   :  { %2207 = vmatprep.subr.bf16.mxu0 %v4494_v31  ;;  %2247 = vmatpush1.bf16.msra.mxu1 %v4549_v56 }
 0x19a   :  { %2248 = vmatprep.subr.bf16.mxu1 %v4557_v61  ;;  %v4548_v61 = vld [vmem:[#allocation8 + $0x8c] ss:$16 sps:$4 sm:$0xff]  }
 0x19c   :  { %2208 = vmatpush1.bf16.msra.mxu0 %v4492_v15 }
 0x19d   :  { %2209 = vmatprep.subr.bf16.mxu0 %v4497_v18  ;;  %2249 = vmatpush1.bf16.msra.mxu1 %v4555_v60  ;;  %v4540_v60 = vld [vmem:[#allocation8 + $0xa8] ss:$16 sps:$4 sm:$0xff]  }
 0x19e   :  { %2250 = vmatprep.subr.bf16.mxu1 %v4563_v1  ;;  %v4560_v1 = vld [vmem:[#allocation8 + $0x4c] ss:$16 sps:$4 sm:$0xff]  }
 0x1a0   :  { %2210 = vmatpush1.bf16.msra.mxu0 %v4495_v32 }
 0x1a1   :  { %2211 = vmatprep.subr.bf16.mxu0 %v4500_v33  ;;  %2251 = vmatpush1.bf16.msra.mxu1 %v4561_v0  ;;  %v4552_v0 = vld [vmem:[#allocation8 + $0x68] ss:$16 sps:$4 sm:$0xff]  }
 0x1a2   :  { %2252 = vmatprep.subr.bf16.mxu1 %v4569_v5  ;;  %v4572_v5 = vld [vmem:[#allocation8 + $0xc] ss:$16 sps:$4 sm:$0xff]  }
 0x1a4   :  { %2212 = vmatpush1.bf16.msra.mxu0 %v4498_v34 }
 0x1a5   :  { %2213 = vmatprep.subr.bf16.mxu0 %v4503_v38  ;;  %2253 = vmatpush1.bf16.msra.mxu1 %v4567_v4  ;;  %v4564_v4 = vld [vmem:[#allocation8 + $0x28] ss:$16 sps:$4 sm:$0xff]  }
 0x1a6   :  { %2254 = vmatprep.subr.bf16.mxu1 %v4575_v9  ;;  %v4584_v9 = vld [vmem:[#allocation8 + $0x1cc] ss:$16 sps:$4 sm:$0xff]  }
 0x1a8   :  { %2214 = vmatpush2.bf16.msra.mxu0 %v4501_v42 }
 0x1a9   :  { %2215 = vmatprep.subr.bf16.mxu0 %v4506_v43  ;;  %2255 = vmatpush2.bf16.msra.mxu1 %v4573_v8  ;;  %v4576_v8 = vld [vmem:[#allocation8 + $0x1e8] ss:$16 sps:$4 sm:$0xff]  }
 0x1aa   :  { %2256 = vmatprep.subr.bf16.mxu1 %v4581_v10  ;;  %v570_v10 = vrot.slane %v5195_v27, %v5171_v37 }
 0x1ac   :  { %2216 = vmatpush2.bf16.msra.mxu0 %v4504_v46 }
 0x1ad   :  { %2217 = vmatprep.subr.bf16.mxu0 %v4509_v47  ;;  %2257 = vmatpush2.bf16.msra.mxu1 %v4579_v11  ;;  %v574_v11 = vrot.slane %v5195_v27, %v5178_v40 }
 0x1ae   :  { %2258 = vmatprep.subr.bf16.mxu1 %v4587_v12  ;;  %v4582_v12 = vld [vmem:[#allocation8 + $0x1c8] ss:$16 sps:$4 sm:$0xff]  }
 0x1b0   :  { %2218 = vmatpush2.bf16.msra.mxu0 %v4507_v50 }
 0x1b1   :  { %2219 = vmatprep.subr.bf16.mxu0 %v4512_v51  ;;  %2259 = vmatpush2.bf16.msra.mxu1 %v4585_v13 }
 0x1b2   :  { %2260 = vmatprep.subr.bf16.mxu1 %v4593_v14  ;;  %v4590_v14 = vld [vmem:[#allocation8 + $0x1ac] ss:$16 sps:$4 sm:$0xff]  }
 0x1b4   :  { %2220 = vmatpush2.bf16.msra.mxu0 %v4510_v54 }
 0x1b5   :  { %2221 = vmatprep.subr.bf16.mxu0 %v4515_v55  ;;  %2261 = vmatpush2.bf16.msra.mxu1 %v4591_v16  ;;  %v4528_v55 = vld [vmem:[#allocation8 + $0xe8] ss:$16 sps:$4 sm:$0xff]  }
 0x1b6   :  { %2262 = vmatprep.subr.bf16.mxu1 %v4599_v17 }
 0x1b8   :  { %2222 = vmatpush2.bf16.msra.mxu0 %v4513_v58  ;;  %v4534_v58 = vld [vmem:[#allocation8 + $0xc8] ss:$16 sps:$4 sm:$0xff]  }
 0x1b9   :  { %2223 = vmatprep.subr.bf16.mxu0 %v4518_v59  ;;  %2263 = vmatpush2.bf16.msra.mxu1 %v4597_v19  ;;  %v4542_v59 = vld [vmem:[#allocation8 + $0xac] ss:$16 sps:$4 sm:$0xff]  }
 0x1ba   :  { %2264 = vmatprep.subr.bf16.mxu1 %v4605_v20 }
 0x1bc   :  { %2224 = vmatpush2.bf16.msra.mxu0 %v4516_v62  ;;  %v4546_v62 = vld [vmem:[#allocation8 + $0x88] ss:$16 sps:$4 sm:$0xff]  }
 0x1bd   :  { %2225 = vmatprep.subr.bf16.mxu0 %v4521_v63  ;;  %2265 = vmatpush2.bf16.msra.mxu1 %v4603_v21  ;;  %v4554_v63 = vld [vmem:[#allocation8 + $0x6c] ss:$16 sps:$4 sm:$0xff]  }
 0x1be   :  { %2266 = vmatprep.subr.bf16.mxu1 %v4611_v22 }
 0x1c0   :  { %2226 = vmatpush2.bf16.msra.mxu0 %v4519_v2  ;;  %v4558_v2 = vld [vmem:[#allocation8 + $0x48] ss:$16 sps:$4 sm:$0xff]  }
 0x1c1   :  { %2227 = vmatprep.subr.bf16.mxu0 %v4524_v3  ;;  %2267 = vmatpush2.bf16.msra.mxu1 %v4609_v23  ;;  %v4566_v3 = vld [vmem:[#allocation8 + $0x2c] ss:$16 sps:$4 sm:$0xff]   ;;  %v4588_v23 = vld [vmem:[#allocation8 + $0x1a8] ss:$16 sps:$4 sm:$0xff]  }
 0x1c2   :  { %2268 = vmatprep.subr.bf16.mxu1 %v4617_v24 }
 0x1c4   :  { %2228 = vmatpush2.bf16.msra.mxu0 %v4522_v6  ;;  %v4570_v6 = vld [vmem:[#allocation8 + $0x8] ss:$16 sps:$4 sm:$0xff]  }
 0x1c5   :  { %2279 = vmatprep.subr.bf16.mxu0 %v4530_v7  ;;  %2269 = vmatpush2.bf16.msra.mxu1 %v4615_v25  ;;  %v4578_v7 = vld [vmem:[#allocation8 + $0x1ec] ss:$16 sps:$4 sm:$0xff]  }
 0x1c6   :  { %2320 = vmatprep.subr.bf16.mxu1 %v4623_v26  ;;  %v4596_v25 = vld [vmem:[#allocation8 + $0x18c] ss:$16 sps:$4 sm:$0xff]  }
 0x207   :  { %v1253_v30 = vpop.f32.mrf.mxu0 }
 0x208   :  { %v1254_v31 = vadd.f32 %v1253_v30, %v562_v28  ;;  %v1294_v15 = vpop.f32.mrf.mxu1 }
 0x209   :  { %v1255_v18 = vpop.f32.mrf.mxu0 }
 0x20a   :  { %v1295_v32 = vadd.f32 %v1294_v15, %v1254_v31  ;;  %v1256_v33 = vadd.f32 %v1255_v18, %v566_v29  ;;  %v1296_v34 = vpop.f32.mrf.mxu1  ;;  %v4594_v15 = vld [vmem:[#allocation8 + $0x188] ss:$16 sps:$4 sm:$0xff]   ;;  %v4602_v18 = vld [vmem:[#allocation8 + $0x16c] ss:$16 sps:$4 sm:$0xff]  }
 0x20b   :  { %v1257_v35 = vpop.f32.mrf.mxu0 }
 0x20c   :  { %v1387_v38 = vmul.f32 0.70710677, %v1295_v32  ;;  %v1297_v41 = vadd.f32 %v1296_v34, %v1256_v33  ;;  %v1298_v42 = vpop.f32.mrf.mxu1  ;;  %v1383_v49 = vmul.f32 0.5, %v1295_v32  ;;  %v4600_v32 = vld [vmem:[#allocation8 + $0x168] ss:$16 sps:$4 sm:$0xff]  }
 0x20d   :  { %v1258_v43 = vpop.f32.mrf.mxu0  ;;  %v4608_v33 = vld [vmem:[#allocation8 + $0x14c] ss:$16 sps:$4 sm:$0xff]   ;;  %v4606_v34 = vld [vmem:[#allocation8 + $0x148] ss:$16 sps:$4 sm:$0xff]  }
 0x20e   :  { %4901 = verf.f32 %v1387_v38  ;;  %v1388_v44 = vmul.f32 0.70710677, %v1297_v41  ;;  %v1299_v45 = vpop.f32.mrf.mxu1  ;;  %v1384_v50 = vmul.f32 0.5, %v1297_v41  ;;  %v4614_v35 = vld [vmem:[#allocation8 + $0x12c] ss:$16 sps:$4 sm:$0xff]  }
 0x20f   :  { %v4612_v38 = vld [vmem:[#allocation8 + $0x128] ss:$16 sps:$4 sm:$0xff]   ;;  %v4620_v42 = vld [vmem:[#allocation8 + $0x10c] ss:$16 sps:$4 sm:$0xff]  }
 0x210   :  { %4903 = verf.f32 %v1388_v44 }
 0x21b   :  { %v4902_v46 = vpop.eup %4901 }
 0x21c   :  { %v1395_v47 = vadd.f32 1.0, %v4902_v46 }
 0x21d   :  { %v4904_v48 = vpop.eup %4903 }
 0x21e   :  { %v1396_v51 = vadd.f32 1.0, %v4904_v48  ;;  %v1399_v52 = vmul.f32 %v1395_v47, %v1383_v49  ;;  %v4618_v47 = vld [vmem:[#allocation8 + $0x108] ss:$16 sps:$4 sm:$0xff]  }
 0x220   :  { %v1400_v53 = vmul.f32 %v1396_v51, %v1384_v50  ;;  %v5201_v56 = vpack.c.bf16 %v1399_v52, %v1399_v52  ;;  %v4621_v52 = vld [vmem:[#allocation8 + $0x2e8] ss:$16 sps:$4 sm:$0xff]  }
 0x222   :  { %v1404_v54 = vpack.c.bf16 %v1400_v53, %v1400_v53 }
 0x224   :  { %2229 = vmatprep.mubr.bf16.mxu0 %v1404_v54 }
 0x225   :  { %2230 = vmatmul.mubr.bf16.vlgmr.msra.gmra.mxu0 %v5201_v56 }
 0x226   :  { %2280 = vmatpush1.bf16.msra.mxu0 %v4528_v55  ;;  %2311 = vmatprep.mubr.bf16.mxu0 %v1404_v54  ;;  %v4626_v54 = vld [vmem:[#allocation8 + $0x2cc] ss:$16 sps:$4 sm:$0xff]   ;;  %v4624_v55 = vld [vmem:[#allocation8 + $0x2c8] ss:$16 sps:$4 sm:$0xff]  }
 0x227   :  { %2281 = vmatprep.subr.bf16.mxu0 %v4536_v57  ;;  %v4629_v57 = vld [vmem:[#allocation8 + $0x2ac] ss:$16 sps:$4 sm:$0xff]  }
 0x22a   :  { %2282 = vmatpush1.bf16.msra.mxu0 %v4534_v58  ;;  %v4627_v58 = vld [vmem:[#allocation8 + $0x2a8] ss:$16 sps:$4 sm:$0xff]  }
 0x22b   :  { %2283 = vmatprep.subr.bf16.mxu0 %v4542_v59  ;;  %v4632_v59 = vld [vmem:[#allocation8 + $0x28c] ss:$16 sps:$4 sm:$0xff]  }
 0x22e   :  { %2284 = vmatpush1.bf16.msra.mxu0 %v4540_v60  ;;  %v4669_v60 = vld [vmem:[#allocation10 + $0xe0] ss:$16 sps:$4 sm:$0xff]  }
 0x22f   :  { %2285 = vmatprep.subr.bf16.mxu0 %v4548_v61  ;;  %v4671_v61 = vld [vmem:[#allocation10 + $0xe4] ss:$16 sps:$4 sm:$0xff]  }
 0x232   :  { %2286 = vmatpush1.bf16.msra.mxu0 %v4546_v62  ;;  %v4674_v62 = vld [vmem:[#allocation10 + $0xc4] ss:$16 sps:$4 sm:$0xff]  }
 0x233   :  { %2287 = vmatprep.subr.bf16.mxu0 %v4554_v63  ;;  %v4630_v63 = vld [vmem:[#allocation8 + $0x288] ss:$16 sps:$4 sm:$0xff]  }
 0x236   :  { %2288 = vmatpush1.bf16.msra.mxu0 %v4552_v0  ;;  %v4672_v0 = vld [vmem:[#allocation10 + $0xc0] ss:$16 sps:$4 sm:$0xff]  }
 0x237   :  { %2289 = vmatprep.subr.bf16.mxu0 %v4560_v1  ;;  %v4635_v1 = vld [vmem:[#allocation8 + $0x26c] ss:$16 sps:$4 sm:$0xff]  }
 0x23a   :  { %2290 = vmatpush1.bf16.msra.mxu0 %v4558_v2  ;;  %v4633_v2 = vld [vmem:[#allocation8 + $0x268] ss:$16 sps:$4 sm:$0xff]  }
 0x23b   :  { %2291 = vmatprep.subr.bf16.mxu0 %v4566_v3  ;;  %v4675_v3 = vld [vmem:[#allocation10 + $0xa0] ss:$16 sps:$4 sm:$0xff]  }
 0x23e   :  { %2292 = vmatpush1.bf16.msra.mxu0 %v4564_v4  ;;  %v4638_v4 = vld [vmem:[#allocation8 + $0x24c] ss:$16 sps:$4 sm:$0xff]  }
 0x23f   :  { %2293 = vmatprep.subr.bf16.mxu0 %v4572_v5  ;;  %v4680_v5 = vld [vmem:[#allocation10 + $0x84] ss:$16 sps:$4 sm:$0xff]  }
 0x242   :  { %2294 = vmatpush1.bf16.msra.mxu0 %v4570_v6  ;;  %v4636_v6 = vld [vmem:[#allocation8 + $0x248] ss:$16 sps:$4 sm:$0xff]  }
 0x243   :  { %2295 = vmatprep.subr.bf16.mxu0 %v4578_v7  ;;  %v4678_v7 = vld [vmem:[#allocation10 + $0x80] ss:$16 sps:$4 sm:$0xff]  }
 0x246   :  { %2296 = vmatpush2.bf16.msra.mxu0 %v4576_v8  ;;  %v4641_v8 = vld [vmem:[#allocation8 + $0x22c] ss:$16 sps:$4 sm:$0xff]  }
 0x247   :  { %v1335_v13 = vpop.f32.mrf.mxu0  ;;  %2297 = vmatprep.subr.bf16.mxu0 %v4584_v9  ;;  %v4683_v9 = vld [vmem:[#allocation10 + $0x64] ss:$16 sps:$4 sm:$0xff]  }
 0x248   :  { %v1336_v16 = vadd.f32 %v1335_v13, %v570_v10  ;;  %v1376_v17 = vpop.f32.mrf.mxu1  ;;  %v4639_v10 = vld [vmem:[#allocation8 + $0x228] ss:$16 sps:$4 sm:$0xff]   ;;  %v4686_v13 = vld [vmem:[#allocation10 + $0x44] ss:$16 sps:$4 sm:$0xff]  }
 0x249   :  { %v1337_v19 = vpop.f32.mrf.mxu0 }
 0x24a   :  { %v1377_v20 = vadd.f32 %v1376_v17, %v1336_v16  ;;  %v1338_v21 = vadd.f32 %v1337_v19, %v574_v11  ;;  %v1378_v22 = vpop.f32.mrf.mxu1  ;;  %2298 = vmatpush2.bf16.msra.mxu0 %v4582_v12  ;;  %v4681_v11 = vld [vmem:[#allocation10 + $0x60] ss:$16 sps:$4 sm:$0xff]   ;;  %v4644_v12 = vld [vmem:[#allocation8 + $0x20c] ss:$16 sps:$4 sm:$0xff]   ;;  %v4689_v19 = vld [vmem:[#allocation10 + $0x24] ss:$16 sps:$4 sm:$0xff]  }
 0x24b   :  { %v1339_v24 = vpop.f32.mrf.mxu0  ;;  %2299 = vmatprep.subr.bf16.mxu0 %v4590_v14  ;;  %v4642_v14 = vld [vmem:[#allocation8 + $0x208] ss:$16 sps:$4 sm:$0xff]   ;;  %v4684_v16 = vld [vmem:[#allocation10 + $0x40] ss:$16 sps:$4 sm:$0xff]   ;;  %v4647_v17 = vld [vmem:[#allocation8 + $0x3ec] ss:$16 sps:$4 sm:$0xff]  }
 0x24c   :  { %v1389_v26 = vmul.f32 0.70710677, %v1377_v20  ;;  %v1379_v28 = vadd.f32 %v1378_v22, %v1338_v21  ;;  %v1380_v29 = vpop.f32.mrf.mxu1  ;;  %v1385_v45 = vmul.f32 0.5, %v1377_v20  ;;  %v4645_v20 = vld [vmem:[#allocation8 + $0x3e8] ss:$16 sps:$4 sm:$0xff]  }
 0x24d   :  { %v1340_v30 = vpop.f32.mrf.mxu0  ;;  %v4687_v21 = vld [vmem:[#allocation10 + $0x20] ss:$16 sps:$4 sm:$0xff]   ;;  %v4650_v22 = vld [vmem:[#allocation8 + $0x3cc] ss:$16 sps:$4 sm:$0xff]   ;;  %v4648_v24 = vld [vmem:[#allocation8 + $0x3c8] ss:$16 sps:$4 sm:$0xff]  }
 0x24e   :  { %4905 = verf.f32 %v1389_v26  ;;  %v1390_v27 = vmul.f32 0.70710677, %v1379_v28  ;;  %v1381_v31 = vpop.f32.mrf.mxu1  ;;  %2300 = vmatpush2.bf16.msra.mxu0 %v4588_v23  ;;  %v1386_v46 = vmul.f32 0.5, %v1379_v28  ;;  %v4692_v23 = vld [vmem:[#allocation10 + $0x4] ss:$16 sps:$4 sm:$0xff]  }
 0x24f   :  { %2301 = vmatprep.subr.bf16.mxu0 %v4596_v25  ;;  %v4690_v25 = vld [vmem:[#allocation10] ss:$16 sps:$4 sm:$0xff]   ;;  %v4653_v26 = vld [vmem:[#allocation8 + $0x3ac] ss:$16 sps:$4 sm:$0xff]   ;;  %v4695_v28 = vld [vmem:[#allocation10 + $0x1e4] ss:$16 sps:$4 sm:$0xff]  }
 0x250   :  { %4907 = verf.f32 %v1390_v27  ;;  %v4651_v29 = vld [vmem:[#allocation8 + $0x3a8] ss:$16 sps:$4 sm:$0xff]   ;;  %v4693_v30 = vld [vmem:[#allocation10 + $0x1e0] ss:$16 sps:$4 sm:$0xff]   ;;  %v4656_v27 = vld [vmem:[#allocation8 + $0x38c] ss:$16 sps:$4 sm:$0xff]  }
 0x251   :  { %v4698_v31 = vld [vmem:[#allocation10 + $0x1c4] ss:$16 sps:$4 sm:$0xff]  }
 0x252   :  { %2302 = vmatpush2.bf16.msra.mxu0 %v4594_v15  ;;  %v4654_v15 = vld [vmem:[#allocation8 + $0x388] ss:$16 sps:$4 sm:$0xff]  }
 0x253   :  { %2303 = vmatprep.subr.bf16.mxu0 %v4602_v18  ;;  %v4696_v18 = vld [vmem:[#allocation10 + $0x1c0] ss:$16 sps:$4 sm:$0xff]  }
 0x256   :  { %2304 = vmatpush2.bf16.msra.mxu0 %v4600_v32  ;;  %v4659_v32 = vld [vmem:[#allocation8 + $0x36c] ss:$16 sps:$4 sm:$0xff]  }
 0x257   :  { %2305 = vmatprep.subr.bf16.mxu0 %v4608_v33  ;;  %v4657_v33 = vld [vmem:[#allocation8 + $0x368] ss:$16 sps:$4 sm:$0xff]  }
 0x25a   :  { %2306 = vmatpush2.bf16.msra.mxu0 %v4606_v34  ;;  %v4662_v34 = vld [vmem:[#allocation8 + $0x34c] ss:$16 sps:$4 sm:$0xff]  }
 0x25b   :  { %v4906_v41 = vpop.eup %4905  ;;  %2307 = vmatprep.subr.bf16.mxu0 %v4614_v35  ;;  %v4660_v35 = vld [vmem:[#allocation8 + $0x348] ss:$16 sps:$4 sm:$0xff]  }
 0x25c   :  { %v1397_v43 = vadd.f32 1.0, %v4906_v41  ;;  %v4663_v41 = vld [vmem:[#allocation8 + $0x328] ss:$16 sps:$4 sm:$0xff]  }
 0x25d   :  { %v4908_v44 = vpop.eup %4907 }
 0x25e   :  { %2308 = vmatpush2.bf16.msra.mxu0 %v4612_v38  ;;  %v1398_v48 = vadd.f32 1.0, %v4908_v44  ;;  %v1401_v49 = vmul.f32 %v1397_v43, %v1385_v45  ;;  %v4665_v38 = vld [vmem:[#allocation8 + $0x32c] ss:$16 sps:$4 sm:$0xff]   ;;  %v4666_v43 = vld [vmem:[#allocation8 + $0x308] ss:$16 sps:$4 sm:$0xff]  }
 0x25f   :  { %2309 = vmatprep.subr.bf16.mxu0 %v4620_v42  ;;  %v4668_v42 = vld [vmem:[#allocation8 + $0x30c] ss:$16 sps:$4 sm:$0xff]   ;;  %v4701_v44 = vld [vmem:[#allocation10 + $0x1a4] ss:$16 sps:$4 sm:$0xff]   ;;  %v4699_v45 = vld [vmem:[#allocation10 + $0x1a0] ss:$16 sps:$4 sm:$0xff]  }
 0x260   :  { %v1402_v50 = vmul.f32 %v1398_v48, %v1386_v46  ;;  %v5208_v53 = vpack.c.bf16 %v1401_v49, %v1401_v49  ;;  %v4704_v46 = vld [vmem:[#allocation10 + $0x184] ss:$16 sps:$4 sm:$0xff]   ;;  %v4705_v49 = vld [vmem:[#allocation10 + $0x160] ss:$16 sps:$4 sm:$0xff]  }
 0x261   :  { %v4707_v48 = vld [vmem:[#allocation10 + $0x164] ss:$16 sps:$4 sm:$0xff]  }
 0x262   :  { %2310 = vmatpush2.bf16.msra.mxu0 %v4618_v47  ;;  %v1406_v51 = vpack.c.bf16 %v1402_v50, %v1402_v50  ;;  %v4702_v47 = vld [vmem:[#allocation10 + $0x180] ss:$16 sps:$4 sm:$0xff]   ;;  %v4710_v50 = vld [vmem:[#allocation10 + $0x144] ss:$16 sps:$4 sm:$0xff]  }
 0x263   :  { %3175 = vmatprep.subr.bf16.mxu0 %v4671_v61  ;;  %v4725_v61 = vld [vmem:[#allocation10 + $0x2c4] ss:$16 sps:$4 sm:$0xff]  }
 0x264   :  { %2270 = vmatprep.mubr.bf16.mxu1 %v1406_v51 }
 0x265   :  { %2271 = vmatmul.mubr.bf16.vlgmr.msra.gmra.mxu1 %v5208_v53  ;;  %2312 = vmatmul.mubr.bf16.vlgmr.msra.gmra.mxu0 %v5201_v56  ;;  %v4677_v56 = vld [vmem:[#allocation10 + $0xa4] ss:$16 sps:$4 sm:$0xff]  }
 0x266   :  { %2321 = vmatpush1.bf16.msra.mxu1 %v4621_v52  ;;  %2352 = vmatprep.mubr.bf16.mxu1 %v1406_v51  ;;  %v4708_v51 = vld [vmem:[#allocation10 + $0x140] ss:$16 sps:$4 sm:$0xff]   ;;  %v4713_v52 = vld [vmem:[#allocation10 + $0x124] ss:$16 sps:$4 sm:$0xff]  }
 0x267   :  { %2322 = vmatprep.subr.bf16.mxu1 %v4626_v54  ;;  %3176 = vmatpush1.bf16.msra.mxu0 %v4669_v60  ;;  %v4711_v54 = vld [vmem:[#allocation10 + $0x120] ss:$16 sps:$4 sm:$0xff]  }
 0x268   :  { %3177 = vmatprep.subr.bf16.mxu0 %v4674_v62  ;;  %v4723_v60 = vld [vmem:[#allocation10 + $0x2c0] ss:$16 sps:$4 sm:$0xff]  }
 0x269   :  { %v4729_v62 = vld [vmem:[#allocation10 + $0x2a0] ss:$16 sps:$4 sm:$0xff]  }
 0x26a   :  { %2323 = vmatpush1.bf16.msra.mxu1 %v4624_v55  ;;  %v4714_v55 = vld [vmem:[#allocation10 + $0x100] ss:$16 sps:$4 sm:$0xff]  }
 0x26b   :  { %2324 = vmatprep.subr.bf16.mxu1 %v4629_v57  ;;  %3178 = vmatpush1.bf16.msra.mxu0 %v4672_v0  ;;  %v4717_v57 = vld [vmem:[#allocation10 + $0x2e0] ss:$16 sps:$4 sm:$0xff]  }
 0x26c   :  { %3179 = vmatprep.subr.bf16.mxu0 %v4677_v56  ;;  %v4735_v0 = vld [vmem:[#allocation10 + $0x280] ss:$16 sps:$4 sm:$0xff]  }
 0x26d   :  { %v4741_v56 = vld [vmem:[#allocation10 + $0x260] ss:$16 sps:$4 sm:$0xff]  }
 0x26e   :  { %2325 = vmatpush1.bf16.msra.mxu1 %v4627_v58  ;;  %v4719_v58 = vld [vmem:[#allocation10 + $0x2e4] ss:$16 sps:$4 sm:$0xff]  }
 0x26f   :  { %2326 = vmatprep.subr.bf16.mxu1 %v4632_v59  ;;  %3180 = vmatpush1.bf16.msra.mxu0 %v4675_v3  ;;  %v4722_v59 = vld [vmem:[#allocation10 + $0xec] ss:$16 sps:$4 sm:$0xff]   ;;  %v4747_v3 = vld [vmem:[#allocation10 + $0x240] ss:$16 sps:$4 sm:$0xff]  }
 0x270   :  { %3181 = vmatprep.subr.bf16.mxu0 %v4680_v5  ;;  %v4753_v5 = vld [vmem:[#allocation10 + $0x220] ss:$16 sps:$4 sm:$0xff]  }
 0x272   :  { %2327 = vmatpush1.bf16.msra.mxu1 %v4630_v63  ;;  %v4731_v63 = vld [vmem:[#allocation10 + $0x2a4] ss:$16 sps:$4 sm:$0xff]  }
 0x273   :  { %2328 = vmatprep.subr.bf16.mxu1 %v4635_v1  ;;  %3182 = vmatpush1.bf16.msra.mxu0 %v4678_v7  ;;  %v4737_v1 = vld [vmem:[#allocation10 + $0x284] ss:$16 sps:$4 sm:$0xff]   ;;  %v4759_v7 = vld [vmem:[#allocation10 + $0x200] ss:$16 sps:$4 sm:$0xff]  }
 0x274   :  { %3183 = vmatprep.subr.bf16.mxu0 %v4683_v9  ;;  %v4765_v9 = vld [vmem:[#allocation10 + $0x3e0] ss:$16 sps:$4 sm:$0xff]  }
 0x276   :  { %2329 = vmatpush1.bf16.msra.mxu1 %v4633_v2  ;;  %v4743_v2 = vld [vmem:[#allocation10 + $0x264] ss:$16 sps:$4 sm:$0xff]  }
 0x277   :  { %2330 = vmatprep.subr.bf16.mxu1 %v4638_v4  ;;  %3184 = vmatpush1.bf16.msra.mxu0 %v4681_v11  ;;  %v4749_v4 = vld [vmem:[#allocation10 + $0x244] ss:$16 sps:$4 sm:$0xff]   ;;  %v4771_v11 = vld [vmem:[#allocation10 + $0x3c0] ss:$16 sps:$4 sm:$0xff]  }
 0x278   :  { %3185 = vmatprep.subr.bf16.mxu0 %v4686_v13 }
 0x27a   :  { %2331 = vmatpush1.bf16.msra.mxu1 %v4636_v6  ;;  %v4755_v6 = vld [vmem:[#allocation10 + $0x224] ss:$16 sps:$4 sm:$0xff]  }
 0x27b   :  { %2332 = vmatprep.subr.bf16.mxu1 %v4641_v8  ;;  %3186 = vmatpush1.bf16.msra.mxu0 %v4684_v16  ;;  %v4761_v8 = vld [vmem:[#allocation10 + $0x204] ss:$16 sps:$4 sm:$0xff]  }
 0x27c   :  { %3187 = vmatprep.subr.bf16.mxu0 %v4689_v19 }
 0x27e   :  { %2333 = vmatpush1.bf16.msra.mxu1 %v4639_v10  ;;  %v4767_v10 = vld [vmem:[#allocation10 + $0x3e4] ss:$16 sps:$4 sm:$0xff]  }
 0x27f   :  { %2334 = vmatprep.subr.bf16.mxu1 %v4644_v12  ;;  %3188 = vmatpush1.bf16.msra.mxu0 %v4687_v21  ;;  %v4773_v12 = vld [vmem:[#allocation10 + $0x3c4] ss:$16 sps:$4 sm:$0xff]  }
 0x280   :  { %3189 = vmatprep.subr.bf16.mxu0 %v4692_v23  ;;  %v4791_v23 = vld [vmem:[#allocation10 + $0x364] ss:$16 sps:$4 sm:$0xff]  }
 0x282   :  { %2335 = vmatpush1.bf16.msra.mxu1 %v4642_v14  ;;  %v4779_v14 = vld [vmem:[#allocation10 + $0x3a4] ss:$16 sps:$4 sm:$0xff]  }
 0x283   :  { %2336 = vmatprep.subr.bf16.mxu1 %v4647_v17  ;;  %3190 = vmatpush1.bf16.msra.mxu0 %v4690_v25  ;;  %v4777_v17 = vld [vmem:[#allocation10 + $0x3a0] ss:$16 sps:$4 sm:$0xff]   ;;  %v4797_v25 = vld [vmem:[#allocation10 + $0x344] ss:$16 sps:$4 sm:$0xff]  }
 0x284   :  { %3191 = vmatprep.subr.bf16.mxu0 %v4695_v28  ;;  %v4803_v28 = vld [vmem:[#allocation10 + $0x324] ss:$16 sps:$4 sm:$0xff]  }
 0x286   :  { %2337 = vmatpush2.bf16.msra.mxu1 %v4645_v20  ;;  %v4785_v20 = vld [vmem:[#allocation10 + $0x384] ss:$16 sps:$4 sm:$0xff]  }
 0x287   :  { %2338 = vmatprep.subr.bf16.mxu1 %v4650_v22  ;;  %3192 = vmatpush2.bf16.msra.mxu0 %v4693_v30  ;;  %v4783_v22 = vld [vmem:[#allocation10 + $0x380] ss:$16 sps:$4 sm:$0xff]   ;;  %v4809_v30 = vld [vmem:[#allocation10 + $0x304] ss:$16 sps:$4 sm:$0xff]  }
 0x288   :  { %3193 = vmatprep.subr.bf16.mxu0 %v4698_v31  ;;  %v4815_v31 = vld [vmem:[#allocation10 + $0x2ec] ss:$16 sps:$4 sm:$0xff]  }
 0x28a   :  { %2339 = vmatpush2.bf16.msra.mxu1 %v4648_v24  ;;  %v4789_v24 = vld [vmem:[#allocation10 + $0x360] ss:$16 sps:$4 sm:$0xff]  }
 0x28b   :  { %2340 = vmatprep.subr.bf16.mxu1 %v4653_v26  ;;  %3194 = vmatpush2.bf16.msra.mxu0 %v4696_v18  ;;  %v4795_v26 = vld [vmem:[#allocation10 + $0x340] ss:$16 sps:$4 sm:$0xff]  }
 0x28c   :  { %3195 = vmatprep.subr.bf16.mxu0 %v4701_v44 }
 0x28e   :  { %2341 = vmatpush2.bf16.msra.mxu1 %v4651_v29  ;;  %v4801_v29 = vld [vmem:[#allocation10 + $0x320] ss:$16 sps:$4 sm:$0xff]  }
 0x28f   :  { %2342 = vmatprep.subr.bf16.mxu1 %v4656_v27  ;;  %3196 = vmatpush2.bf16.msra.mxu0 %v4699_v45  ;;  %v4807_v27 = vld [vmem:[#allocation10 + $0x300] ss:$16 sps:$4 sm:$0xff]  }
 0x290   :  { %3197 = vmatprep.subr.bf16.mxu0 %v4704_v46 }
 0x292   :  { %2343 = vmatpush2.bf16.msra.mxu1 %v4654_v15  ;;  %v5216_v15 = vld [vmem:[%s5262_s6] sm:$0xf] }
 0x293   :  { %2344 = vmatprep.subr.bf16.mxu1 %v4659_v32  ;;  %3198 = vmatpush2.bf16.msra.mxu0 %v4702_v47  ;;  %v1540_v18 = vrot.slane %v5216_v15, %v5169_v36  ;;  %v1544_v32 = vrot.slane %v5216_v15, %v5176_v39 }
 0x294   :  { %3199 = vmatprep.subr.bf16.mxu0 %v4707_v48 }
 0x296   :  { %2345 = vmatpush2.bf16.msra.mxu1 %v4657_v33 }
 0x297   :  { %2346 = vmatprep.subr.bf16.mxu1 %v4662_v34  ;;  %3200 = vmatpush2.bf16.msra.mxu0 %v4705_v49 }
 0x298   :  { %3201 = vmatprep.subr.bf16.mxu0 %v4710_v50 }
 0x29a   :  { %2347 = vmatpush2.bf16.msra.mxu1 %v4660_v35 }
 0x29b   :  { %2348 = vmatprep.subr.bf16.mxu1 %v4665_v38  ;;  %3202 = vmatpush2.bf16.msra.mxu0 %v4708_v51 }
 0x29c   :  { %3203 = vmatprep.subr.bf16.mxu0 %v4713_v52 }
 0x29e   :  { %2349 = vmatpush2.bf16.msra.mxu1 %v4663_v41 }
 0x29f   :  { %2350 = vmatprep.subr.bf16.mxu1 %v4668_v42  ;;  %3204 = vmatpush2.bf16.msra.mxu0 %v4711_v54 }
 0x2a2   :  { %2351 = vmatpush2.bf16.msra.mxu1 %v4666_v43 }
 0x2a3   :  { %3216 = vmatprep.subr.bf16.mxu1 %v4719_v58 }
 0x2a5   :  { %2353 = vmatmul.mubr.bf16.vlgmr.msra.gmra.mxu1 %v5208_v53  ;;  %v4716_v53 = vld [vmem:[#allocation10 + $0x104] ss:$16 sps:$4 sm:$0xff]  }
 0x2a6   :  { %3205 = vmatprep.subr.bf16.mxu0 %v4716_v53  ;;  %3217 = vmatpush1.bf16.msra.mxu1 %v4717_v57 }
 0x2a7   :  { %3206 = vmatpush2.bf16.msra.mxu0 %v4714_v55  ;;  %3218 = vmatprep.subr.bf16.mxu1 %v4725_v61  ;;  %v4720_v61 = vld [vmem:[#allocation10 + $0xe8] ss:$16 sps:$4 sm:$0xff]  }
 0x2a8   :  { %3257 = vmatprep.subr.bf16.mxu0 %v4722_v59 }
 0x2aa   :  { %3219 = vmatpush1.bf16.msra.mxu1 %v4723_v60 }
 0x2ab   :  { %3220 = vmatprep.subr.bf16.mxu1 %v4731_v63  ;;  %v4728_v63 = vld [vmem:[#allocation10 + $0xcc] ss:$16 sps:$4 sm:$0xff]  }
 0x2ae   :  { %3221 = vmatpush1.bf16.msra.mxu1 %v4729_v62 }
 0x2af   :  { %3222 = vmatprep.subr.bf16.mxu1 %v4737_v1  ;;  %v4734_v1 = vld [vmem:[#allocation10 + $0xac] ss:$16 sps:$4 sm:$0xff]  }
 0x2b2   :  { %3223 = vmatpush1.bf16.msra.mxu1 %v4735_v0  ;;  %v4726_v0 = vld [vmem:[#allocation10 + $0xc8] ss:$16 sps:$4 sm:$0xff]  }
 0x2b3   :  { %3224 = vmatprep.subr.bf16.mxu1 %v4743_v2  ;;  %v4740_v2 = vld [vmem:[#allocation10 + $0x8c] ss:$16 sps:$4 sm:$0xff]  }
 0x2b6   :  { %3225 = vmatpush1.bf16.msra.mxu1 %v4741_v56  ;;  %v4732_v56 = vld [vmem:[#allocation10 + $0xa8] ss:$16 sps:$4 sm:$0xff]  }
 0x2b7   :  { %3226 = vmatprep.subr.bf16.mxu1 %v4749_v4  ;;  %v4746_v4 = vld [vmem:[#allocation10 + $0x6c] ss:$16 sps:$4 sm:$0xff]  }
 0x2ba   :  { %3227 = vmatpush1.bf16.msra.mxu1 %v4747_v3  ;;  %v4738_v3 = vld [vmem:[#allocation10 + $0x88] ss:$16 sps:$4 sm:$0xff]  }
 0x2bb   :  { %3228 = vmatprep.subr.bf16.mxu1 %v4755_v6  ;;  %v4752_v6 = vld [vmem:[#allocation10 + $0x4c] ss:$16 sps:$4 sm:$0xff]  }
 0x2be   :  { %3229 = vmatpush1.bf16.msra.mxu1 %v4753_v5  ;;  %v4744_v5 = vld [vmem:[#allocation10 + $0x68] ss:$16 sps:$4 sm:$0xff]  }
 0x2bf   :  { %3230 = vmatprep.subr.bf16.mxu1 %v4761_v8  ;;  %v4758_v8 = vld [vmem:[#allocation10 + $0x2c] ss:$16 sps:$4 sm:$0xff]  }
 0x2c2   :  { %3231 = vmatpush1.bf16.msra.mxu1 %v4759_v7  ;;  %v4750_v7 = vld [vmem:[#allocation10 + $0x48] ss:$16 sps:$4 sm:$0xff]  }
 0x2c3   :  { %3232 = vmatprep.subr.bf16.mxu1 %v4767_v10  ;;  %v4764_v10 = vld [vmem:[#allocation10 + $0xc] ss:$16 sps:$4 sm:$0xff]  }
 0x2c6   :  { %3233 = vmatpush2.bf16.msra.mxu1 %v4765_v9  ;;  %v4756_v9 = vld [vmem:[#allocation10 + $0x28] ss:$16 sps:$4 sm:$0xff]  }
 0x2c7   :  { %3234 = vmatprep.subr.bf16.mxu1 %v4773_v12  ;;  %v4770_v12 = vld [vmem:[#allocation10 + $0x1ec] ss:$16 sps:$4 sm:$0xff]  }
 0x2ca   :  { %3235 = vmatpush2.bf16.msra.mxu1 %v4771_v11  ;;  %v4762_v11 = vld [vmem:[#allocation10 + $0x8] ss:$16 sps:$4 sm:$0xff]  }
 0x2cb   :  { %3236 = vmatprep.subr.bf16.mxu1 %v4779_v14  ;;  %v4776_v14 = vld [vmem:[#allocation10 + $0x1cc] ss:$16 sps:$4 sm:$0xff]  }
 0x2ce   :  { %3237 = vmatpush2.bf16.msra.mxu1 %v4777_v17  ;;  %v1552_v17 = vrot.slane %v5216_v15, %v5178_v40 }
 0x2cf   :  { %3238 = vmatprep.subr.bf16.mxu1 %v4785_v20  ;;  %v4782_v20 = vld [vmem:[#allocation10 + $0x1ac] ss:$16 sps:$4 sm:$0xff]  }
 0x2d2   :  { %3239 = vmatpush2.bf16.msra.mxu1 %v4783_v22 }
 0x2d3   :  { %3240 = vmatprep.subr.bf16.mxu1 %v4791_v23 }
 0x2d6   :  { %3241 = vmatpush2.bf16.msra.mxu1 %v4789_v24 }
 0x2d7   :  { %3242 = vmatprep.subr.bf16.mxu1 %v4797_v25  ;;  %v4780_v25 = vld [vmem:[#allocation10 + $0x1a8] ss:$16 sps:$4 sm:$0xff]  }
 0x2da   :  { %3243 = vmatpush2.bf16.msra.mxu1 %v4795_v26 }
 0x2db   :  { %3244 = vmatprep.subr.bf16.mxu1 %v4803_v28  ;;  %v4788_v28 = vld [vmem:[#allocation10 + $0x18c] ss:$16 sps:$4 sm:$0xff]  }
 0x2de   :  { %3245 = vmatpush2.bf16.msra.mxu1 %v4801_v29 }
 0x2df   :  { %3246 = vmatprep.subr.bf16.mxu1 %v4809_v30 }
 0x2e2   :  { %3247 = vmatpush2.bf16.msra.mxu1 %v4807_v27 }
 0x2e3   :  { %3298 = vmatprep.subr.bf16.mxu1 %v4815_v31 }
 0x2e5   :  { %v2231_v13 = vpop.f32.mrf.mxu0 }
 0x2e6   :  { %v2232_v33 = vadd.f32 %v2231_v13, %v1540_v18  ;;  %v4768_v13 = vld [vmem:[#allocation10 + $0x1e8] ss:$16 sps:$4 sm:$0xff]  }
 0x2e7   :  { %v2233_v16 = vpop.f32.mrf.mxu0 }
 0x2e8   :  { %v2234_v38 = vadd.f32 %v2233_v16, %v1544_v32  ;;  %v1548_v16 = vrot.slane %v5216_v15, %v5171_v37  ;;  %v4786_v15 = vld [vmem:[#allocation10 + $0x188] ss:$16 sps:$4 sm:$0xff]   ;;  %v4794_v32 = vld [vmem:[#allocation10 + $0x16c] ss:$16 sps:$4 sm:$0xff]  }
 0x2e9   :  { %v2235_v19 = vpop.f32.mrf.mxu0 }
 0x2ea   :  { %v4774_v19 = vld [vmem:[#allocation10 + $0x1c8] ss:$16 sps:$4 sm:$0xff]  }
 0x2eb   :  { %v2236_v21 = vpop.f32.mrf.mxu0 }
 0x325   :  { %v2272_v34 = vpop.f32.mrf.mxu1  ;;  %v5222_v35 = vpop.f32.mrf.mxu0 }
 0x326   :  { %v2273_v41 = vadd.f32 %v2272_v34, %v2232_v33  ;;  %v2314_v21 = vadd.f32 %v5222_v35, %v1548_v16  ;;  %v4792_v33 = vld [vmem:[#allocation10 + $0x168] ss:$16 sps:$4 sm:$0xff]   ;;  %v4800_v34 = vld [vmem:[#allocation10 + $0x14c] ss:$16 sps:$4 sm:$0xff]  }
 0x327   :  { %v2274_v42 = vpop.f32.mrf.mxu1  ;;  %v5224_v43 = vpop.f32.mrf.mxu0  ;;  %v4798_v35 = vld [vmem:[#allocation10 + $0x148] ss:$16 sps:$4 sm:$0xff]   ;;  %v4851_v16 = vld [vmem:[#allocation10 + $0x36c] ss:$16 sps:$4 sm:$0xff]  }
 0x328   :  { %v2365_v44 = vmul.f32 0.70710677, %v2273_v41  ;;  %v2275_v45 = vadd.f32 %v2274_v42, %v2234_v38  ;;  %v2361_v53 = vmul.f32 0.5, %v2273_v41  ;;  %v2316_v23 = vadd.f32 %v5224_v43, %v1552_v17  ;;  %v4806_v38 = vld [vmem:[#allocation10 + $0x12c] ss:$16 sps:$4 sm:$0xff]  }
 0x329   :  { %v2276_v46 = vpop.f32.mrf.mxu1  ;;  %v2317_v47 = vpop.f32.mrf.mxu0  ;;  %v4804_v41 = vld [vmem:[#allocation10 + $0x128] ss:$16 sps:$4 sm:$0xff]   ;;  %v4812_v43 = vld [vmem:[#allocation10 + $0x10c] ss:$16 sps:$4 sm:$0xff]  }
 0x32a   :  { %4909 = verf.f32 %v2365_v44  ;;  %v2366_v48 = vmul.f32 0.70710677, %v2275_v45  ;;  %v2362_v55 = vmul.f32 0.5, %v2275_v45  ;;  %v4849_v17 = vld [vmem:[#allocation10 + $0x368] ss:$16 sps:$4 sm:$0xff]  }
 0x32b   :  { %v2277_v49 = vpop.f32.mrf.mxu1  ;;  %v2318_v50 = vpop.f32.mrf.mxu0 }
 0x32c   :  { %4911 = verf.f32 %v2366_v48  ;;  %v4810_v48 = vld [vmem:[#allocation10 + $0x108] ss:$16 sps:$4 sm:$0xff]  }
 0x337   :  { %v4910_v51 = vpop.eup %4909 }
 0x338   :  { %v2373_v52 = vadd.f32 1.0, %v4910_v51 }
 0x339   :  { %v4912_v54 = vpop.eup %4911 }
 0x33a   :  { %v2374_v57 = vadd.f32 1.0, %v4912_v54  ;;  %v2377_v58 = vmul.f32 %v2373_v52, %v2361_v53  ;;  %v4813_v54 = vld [vmem:[#allocation10 + $0x2e8] ss:$16 sps:$4 sm:$0xff]  }
 0x33c   :  { %v2378_v59 = vmul.f32 %v2374_v57, %v2362_v55  ;;  %v5226_v62 = vpack.c.bf16 %v2377_v58, %v2377_v58  ;;  %v4818_v55 = vld [vmem:[#allocation10 + $0x2cc] ss:$16 sps:$4 sm:$0xff]   ;;  %v4816_v57 = vld [vmem:[#allocation10 + $0x2c8] ss:$16 sps:$4 sm:$0xff]  }
 0x33d   :  { %v4821_v58 = vld [vmem:[#allocation10 + $0x2ac] ss:$16 sps:$4 sm:$0xff]  }
 0x33e   :  { %v2382_v60 = vpack.c.bf16 %v2378_v59, %v2378_v59  ;;  %v4819_v59 = vld [vmem:[#allocation10 + $0x2a8] ss:$16 sps:$4 sm:$0xff]  }
 0x340   :  { %3207 = vmatprep.mubr.bf16.mxu0 %v2382_v60 }
 0x341   :  { %3208 = vmatmul.mubr.bf16.vlgmr.msra.gmra.mxu0 %v5226_v62 }
 0x342   :  { %3258 = vmatpush1.bf16.msra.mxu0 %v4720_v61  ;;  %3289 = vmatprep.mubr.bf16.mxu0 %v2382_v60  ;;  %v4824_v60 = vld [vmem:[#allocation10 + $0x28c] ss:$16 sps:$4 sm:$0xff]  }
 0x343   :  { %3259 = vmatprep.subr.bf16.mxu0 %v4728_v63  ;;  %v4861_v61 = vld [vmem:[#allocation11 + $0x78] sm:$0xff]  }
 0x344   :  { %v4862_v63 = vld [vmem:[#allocation11 + $0x38] sm:$0xff]  }
 0x346   :  { %3260 = vmatpush1.bf16.msra.mxu0 %v4726_v0  ;;  %v4822_v0 = vld [vmem:[#allocation10 + $0x288] ss:$16 sps:$4 sm:$0xff]  }
 0x347   :  { %3261 = vmatprep.subr.bf16.mxu0 %v4734_v1  ;;  %v4827_v1 = vld [vmem:[#allocation10 + $0x26c] ss:$16 sps:$4 sm:$0xff]  }
 0x34a   :  { %3262 = vmatpush1.bf16.msra.mxu0 %v4732_v56  ;;  %v4825_v56 = vld [vmem:[#allocation10 + $0x268] ss:$16 sps:$4 sm:$0xff]  }
 0x34b   :  { %3263 = vmatprep.subr.bf16.mxu0 %v4740_v2  ;;  %v4828_v2 = vld [vmem:[#allocation10 + $0x248] ss:$16 sps:$4 sm:$0xff]  }
 0x34e   :  { %3264 = vmatpush1.bf16.msra.mxu0 %v4738_v3  ;;  %v4833_v3 = vld [vmem:[#allocation10 + $0x22c] ss:$16 sps:$4 sm:$0xff]  }
 0x34f   :  { %3265 = vmatprep.subr.bf16.mxu0 %v4746_v4  ;;  %v4831_v4 = vld [vmem:[#allocation10 + $0x228] ss:$16 sps:$4 sm:$0xff]  }
 0x352   :  { %3266 = vmatpush1.bf16.msra.mxu0 %v4744_v5  ;;  %v4836_v5 = vld [vmem:[#allocation10 + $0x20c] ss:$16 sps:$4 sm:$0xff]  }
 0x353   :  { %3267 = vmatprep.subr.bf16.mxu0 %v4752_v6  ;;  %v4834_v6 = vld [vmem:[#allocation10 + $0x208] ss:$16 sps:$4 sm:$0xff]  }
 0x356   :  { %3268 = vmatpush1.bf16.msra.mxu0 %v4750_v7  ;;  %v4839_v7 = vld [vmem:[#allocation10 + $0x3ec] ss:$16 sps:$4 sm:$0xff]  }
 0x357   :  { %3269 = vmatprep.subr.bf16.mxu0 %v4758_v8  ;;  %v4837_v8 = vld [vmem:[#allocation10 + $0x3e8] ss:$16 sps:$4 sm:$0xff]  }
 0x35a   :  { %3270 = vmatpush1.bf16.msra.mxu0 %v4756_v9  ;;  %v4842_v9 = vld [vmem:[#allocation10 + $0x3cc] ss:$16 sps:$4 sm:$0xff]  }
 0x35b   :  { %3271 = vmatprep.subr.bf16.mxu0 %v4764_v10  ;;  %v4840_v10 = vld [vmem:[#allocation10 + $0x3c8] ss:$16 sps:$4 sm:$0xff]  }
 0x35e   :  { %3272 = vmatpush1.bf16.msra.mxu0 %v4762_v11  ;;  %v4845_v11 = vld [vmem:[#allocation10 + $0x3ac] ss:$16 sps:$4 sm:$0xff]  }
 0x35f   :  { %3273 = vmatprep.subr.bf16.mxu0 %v4770_v12  ;;  %v4843_v12 = vld [vmem:[#allocation10 + $0x3a8] ss:$16 sps:$4 sm:$0xff]  }
 0x362   :  { %3274 = vmatpush2.bf16.msra.mxu0 %v4768_v13  ;;  %v4848_v13 = vld [vmem:[#allocation10 + $0x38c] ss:$16 sps:$4 sm:$0xff]  }
 0x363   :  { %3275 = vmatprep.subr.bf16.mxu0 %v4776_v14  ;;  %v4846_v14 = vld [vmem:[#allocation10 + $0x388] ss:$16 sps:$4 sm:$0xff]  }
 0x365   :  { %v2354_v22 = vpop.f32.mrf.mxu1 }
 0x366   :  { %v2355_v24 = vadd.f32 %v2354_v22, %v2314_v21  ;;  %3276 = vmatpush2.bf16.msra.mxu0 %v4774_v19  ;;  %v4854_v19 = vld [vmem:[#allocation10 + $0x34c] ss:$16 sps:$4 sm:$0xff]   ;;  %v4855_v22 = vld [vmem:[#allocation10 + $0x328] ss:$16 sps:$4 sm:$0xff]  }
 0x367   :  { %v2356_v26 = vpop.f32.mrf.mxu1  ;;  %3277 = vmatprep.subr.bf16.mxu0 %v4782_v20  ;;  %v4852_v20 = vld [vmem:[#allocation10 + $0x348] ss:$16 sps:$4 sm:$0xff]   ;;  %v4857_v21 = vld [vmem:[#allocation10 + $0x32c] ss:$16 sps:$4 sm:$0xff]  }
 0x368   :  { %v2367_v29 = vmul.f32 0.70710677, %v2355_v24  ;;  %v2357_v30 = vadd.f32 %v2356_v26, %v2316_v23  ;;  %v2363_v46 = vmul.f32 0.5, %v2355_v24  ;;  %v4860_v23 = vld [vmem:[#allocation10 + $0x30c] ss:$16 sps:$4 sm:$0xff]   ;;  %v4864_v26 = vld [vmem:[#allocation11 + $0x30] sm:$0xff]  }
 0x369   :  { %v2358_v27 = vpop.f32.mrf.mxu1  ;;  %v4858_v24 = vld [vmem:[#allocation10 + $0x308] ss:$16 sps:$4 sm:$0xff]  }
 0x36a   :  { %4913 = verf.f32 %v2367_v29  ;;  %v2368_v31 = vmul.f32 0.70710677, %v2357_v30  ;;  %3278 = vmatpush2.bf16.msra.mxu0 %v4780_v25  ;;  %v2364_v47 = vmul.f32 0.5, %v2357_v30  ;;  %v4863_v25 = vld [vmem:[#allocation11 + $0x70] sm:$0xff]   ;;  %v4866_v29 = vld [vmem:[#allocation11 + $0x28] sm:$0xff]   ;;  %v4867_v30 = vld [vmem:[#allocation11 + $0x60] sm:$0xff]  }
 0x36b   :  { %v2359_v18 = vpop.f32.mrf.mxu1  ;;  %3279 = vmatprep.subr.bf16.mxu0 %v4788_v28  ;;  %v4865_v28 = vld [vmem:[#allocation11 + $0x68] sm:$0xff]   ;;  %v4868_v27 = vld [vmem:[#allocation11 + $0x20] sm:$0xff]  }
 0x36c   :  { %4915 = verf.f32 %v2368_v31  ;;  %v4869_v31 = vld [vmem:[#allocation11 + $0x58] sm:$0xff]   ;;  %v4871_v18 = vld [vmem:[#allocation11 + $0x50] sm:$0xff]  }
 0x36e   :  { %3280 = vmatpush2.bf16.msra.mxu0 %v4786_v15  ;;  %v4870_v15 = vld [vmem:[#allocation11 + $0x18] sm:$0xff]  }
 0x36f   :  { %3281 = vmatprep.subr.bf16.mxu0 %v4794_v32  ;;  %v4872_v32 = vld [vmem:[#allocation11 + $0x10] sm:$0xff]  }
 0x372   :  { %3282 = vmatpush2.bf16.msra.mxu0 %v4792_v33  ;;  %v4873_v33 = vld [vmem:[#allocation11 + $0x48] sm:$0xff]  }
 0x373   :  { %3283 = vmatprep.subr.bf16.mxu0 %v4800_v34  ;;  %v4874_v34 = vld [vmem:[#allocation11 + $0x8] sm:$0xff]  }
 0x376   :  { %3284 = vmatpush2.bf16.msra.mxu0 %v4798_v35  ;;  %v4875_v35 = vld [vmem:[#allocation11 + $0x40] sm:$0xff]  }
 0x377   :  { %v4914_v42 = vpop.eup %4913  ;;  %3285 = vmatprep.subr.bf16.mxu0 %v4806_v38  ;;  %v4876_v38 = vld [vmem:[#allocation11] sm:$0xff]  }
 0x378   :  { %v2375_v44 = vadd.f32 1.0, %v4914_v42  ;;  %v4878_v42 = vld [vmem:[#allocation11 + $0xb8] sm:$0xff]  }
 0x379   :  { %v4916_v45 = vpop.eup %4915 }
 0x37a   :  { %3286 = vmatpush2.bf16.msra.mxu0 %v4804_v41  ;;  %v2376_v49 = vadd.f32 1.0, %v4916_v45  ;;  %v2379_v50 = vmul.f32 %v2375_v44, %v2363_v46  ;;  %v4877_v41 = vld [vmem:[#allocation11 + $0xf8] sm:$0xff]   ;;  %v4880_v44 = vld [vmem:[#allocation11 + $0xb0] sm:$0xff]  }
 0x37b   :  { %3287 = vmatprep.subr.bf16.mxu0 %v4812_v43  ;;  %v4879_v43 = vld [vmem:[#allocation11 + $0xf0] sm:$0xff]  }
 0x37c   :  { %v2380_v51 = vmul.f32 %v2376_v49, %v2364_v47  ;;  %v5235_v53 = vpack.c.bf16 %v2379_v50, %v2379_v50  ;;  %v4881_v47 = vld [vmem:[#allocation11 + $0xe8] sm:$0xff]  }
 0x37e   :  { %3288 = vmatpush2.bf16.msra.mxu0 %v4810_v48  ;;  %v2384_v52 = vpack.c.bf16 %v2380_v51, %v2380_v51  ;;  %v4882_v48 = vld [vmem:[#allocation11 + $0xa8] sm:$0xff]   ;;  %v4883_v51 = vld [vmem:[#allocation11 + $0xe0] sm:$0xff]  }
 0x37f   :  { %4188 = vmatprep.subr.bf16.mxu0 %v4861_v61  ;;  %v4892_v61 = vld [vmem:[#allocation11 + $0x80] sm:$0xff]  }
 0x380   :  { %3248 = vmatprep.mubr.bf16.mxu1 %v2384_v52 }
 0x381   :  { %3249 = vmatmul.mubr.bf16.vlgmr.msra.gmra.mxu1 %v5235_v53  ;;  %3290 = vmatmul.mubr.bf16.vlgmr.msra.gmra.mxu0 %v5226_v62  ;;  %v4830_v62 = vld [vmem:[#allocation10 + $0x24c] ss:$16 sps:$4 sm:$0xff]  }
 0x382   :  { %3299 = vmatpush1.bf16.msra.mxu1 %v4813_v54  ;;  %3330 = vmatprep.mubr.bf16.mxu1 %v2384_v52  ;;  %v4884_v52 = vld [vmem:[#allocation11 + $0xa0] sm:$0xff]   ;;  %v4885_v54 = vld [vmem:[#allocation11 + $0xd8] sm:$0xff]  }
 0x383   :  { %3300 = vmatprep.subr.bf16.mxu1 %v4818_v55  ;;  %4189 = vmatpush3.bf16.msra.mxu0 %v4862_v63  ;;  %v4887_v55 = vld [vmem:[#allocation11 + $0xd0] sm:$0xff]  }
 0x384   :  { %4190 = vmatprep.subr.bf16.mxu0 %v4863_v25  ;;  %v2513_v63 = vld [vmem:[%s5264_s8] sm:$0xf] }
 0x385   :  { %v2530_v25 = vrot.slane %v2513_v63, %v5178_v40 }
 0x386   :  { %3301 = vmatpush1.bf16.msra.mxu1 %v4816_v57  ;;  %v4888_v57 = vld [vmem:[#allocation11 + $0x90] sm:$0xff]  }
 0x387   :  { %3302 = vmatprep.subr.bf16.mxu1 %v4821_v58  ;;  %4191 = vmatpush3.bf16.msra.mxu0 %v4864_v26  ;;  %v4889_v58 = vld [vmem:[#allocation11 + $0xc8] sm:$0xff]  }
 0x388   :  { %4192 = vmatprep.subr.bf16.mxu0 %v4865_v28 }
 0x38a   :  { %3303 = vmatpush1.bf16.msra.mxu1 %v4819_v59  ;;  %v4890_v59 = vld [vmem:[#allocation11 + $0x88] sm:$0xff]  }
 0x38b   :  { %3304 = vmatprep.subr.bf16.mxu1 %v4824_v60  ;;  %4193 = vmatpush3.bf16.msra.mxu0 %v4866_v29  ;;  %v4891_v60 = vld [vmem:[#allocation11 + $0xc0] sm:$0xff]  }
 0x38c   :  { %4194 = vmatprep.subr.bf16.mxu0 %v4867_v30 }
 0x38e   :  { %3305 = vmatpush1.bf16.msra.mxu1 %v4822_v0  ;;  %v2518_v0 = vrot.slane %v2513_v63, %v5169_v36 }
 0x38f   :  { %3306 = vmatprep.subr.bf16.mxu1 %v4827_v1  ;;  %4195 = vmatpush3.bf16.msra.mxu0 %v4868_v27  ;;  %v2522_v1 = vrot.slane %v2513_v63, %v5176_v39 }
 0x390   :  { %4196 = vmatprep.subr.bf16.mxu0 %v4869_v31 }
 0x392   :  { %3307 = vmatpush1.bf16.msra.mxu1 %v4825_v56 }
 0x393   :  { %3308 = vmatprep.subr.bf16.mxu1 %v4830_v62  ;;  %4197 = vmatpush3.bf16.msra.mxu0 %v4870_v15 }
 0x394   :  { %4198 = vmatprep.subr.bf16.mxu0 %v4871_v18 }
 0x396   :  { %3309 = vmatpush1.bf16.msra.mxu1 %v4828_v2 }
 0x397   :  { %3310 = vmatprep.subr.bf16.mxu1 %v4833_v3  ;;  %4199 = vmatpush3.bf16.msra.mxu0 %v4872_v32 }
 0x398   :  { %4200 = vmatprep.subr.bf16.mxu0 %v4873_v33 }
 0x39a   :  { %3311 = vmatpush1.bf16.msra.mxu1 %v4831_v4 }
 0x39b   :  { %3312 = vmatprep.subr.bf16.mxu1 %v4836_v5  ;;  %4201 = vmatpush3.bf16.msra.mxu0 %v4874_v34 }
 0x39c   :  { %4202 = vmatprep.subr.bf16.mxu0 %v4875_v35 }
 0x39e   :  { %3313 = vmatpush1.bf16.msra.mxu1 %v4834_v6 }
 0x39f   :  { %3314 = vmatprep.subr.bf16.mxu1 %v4839_v7  ;;  %4203 = vmatpush3.bf16.msra.mxu0 %v4876_v38 }
 0x3a2   :  { %3315 = vmatpush2.bf16.msra.mxu1 %v4837_v8 }
 0x3a3   :  { %3316 = vmatprep.subr.bf16.mxu1 %v4842_v9 }
 0x3a6   :  { %3317 = vmatpush2.bf16.msra.mxu1 %v4840_v10 }
 0x3a7   :  { %3318 = vmatprep.subr.bf16.mxu1 %v4845_v11 }
 0x3aa   :  { %3319 = vmatpush2.bf16.msra.mxu1 %v4843_v12 }
 0x3ab   :  { %3320 = vmatprep.subr.bf16.mxu1 %v4848_v13 }
 0x3ae   :  { %3321 = vmatpush2.bf16.msra.mxu1 %v4846_v14 }
 0x3af   :  { %3322 = vmatprep.subr.bf16.mxu1 %v4851_v16 }
 0x3b2   :  { %3323 = vmatpush2.bf16.msra.mxu1 %v4849_v17 }
 0x3b3   :  { %3324 = vmatprep.subr.bf16.mxu1 %v4854_v19 }
 0x3b6   :  { %3325 = vmatpush2.bf16.msra.mxu1 %v4852_v20 }
 0x3b7   :  { %3326 = vmatprep.subr.bf16.mxu1 %v4857_v21 }
 0x3ba   :  { %3327 = vmatpush2.bf16.msra.mxu1 %v4855_v22 }
 0x3bb   :  { %3328 = vmatprep.subr.bf16.mxu1 %v4860_v23 }
 0x3be   :  { %3329 = vmatpush2.bf16.msra.mxu1 %v4858_v24  ;;  %v2526_v24 = vrot.slane %v2513_v63, %v5171_v37 }
 0x3bf   :  { %4210 = vmatprep.subr.bf16.mxu1 %v4877_v41 }
 0x3c1   :  { %3331 = vmatmul.mubr.bf16.vlgmr.msra.gmra.mxu1 %v5235_v53  ;;  %v4886_v53 = vld [vmem:[#allocation11 + $0x98] sm:$0xff]  }
 0x3c2   :  { %4211 = vmatpush3.bf16.msra.mxu1 %v4878_v42 }
 0x3c3   :  { %4212 = vmatprep.subr.bf16.mxu1 %v4879_v43 }
 0x3c6   :  { %4213 = vmatpush3.bf16.msra.mxu1 %v4880_v44 }
 0x3c7   :  { %4214 = vmatprep.subr.bf16.mxu1 %v4881_v47 }
 0x3ca   :  { %4215 = vmatpush3.bf16.msra.mxu1 %v4882_v48 }
 0x3cb   :  { %4216 = vmatprep.subr.bf16.mxu1 %v4883_v51  ;;  %v4153_v51 = vld [vmem:[%s5266_s10] ss:$0 sm:$0xff] }
 0x3ce   :  { %4217 = vmatpush3.bf16.msra.mxu1 %v4884_v52 }
 0x3cf   :  { %4218 = vmatprep.subr.bf16.mxu1 %v4885_v54 }
 0x3d2   :  { %4219 = vmatpush3.bf16.msra.mxu1 %v4886_v53 }
 0x3d3   :  { %4220 = vmatprep.subr.bf16.mxu1 %v4887_v55 }
 0x3d6   :  { %4221 = vmatpush3.bf16.msra.mxu1 %v4888_v57 }
 0x3d7   :  { %4222 = vmatprep.subr.bf16.mxu1 %v4889_v58 }
 0x3da   :  { %4223 = vmatpush3.bf16.msra.mxu1 %v4890_v59 }
 0x3db   :  { %4224 = vmatprep.subr.bf16.mxu1 %v4891_v60 }
 0x3de   :  { %4225 = vmatpush3.bf16.msra.mxu1 %v4892_v61 }
 0x401   :  { %v3209_v45 = vpop.f32.mrf.mxu0 }
 0x402   :  { %v3210_v56 = vadd.f32 %v3209_v45, %v2518_v0 }
 0x403   :  { %v3211_v46 = vpop.f32.mrf.mxu0 }
 0x404   :  { %v3212_v3 = vadd.f32 %v3211_v46, %v2522_v1  ;;  %v4186_v1 = vld [vmem:[%s5267_s11] ss:$0 sm:$0xff] }
 0x405   :  { %v3213_v49 = vpop.f32.mrf.mxu0 }
 0x407   :  { %v3214_v50 = vpop.f32.mrf.mxu0 }
 0x441   :  { %v3250_v62 = vpop.f32.mrf.mxu1  ;;  %v3291_v2 = vpop.f32.mrf.mxu0 }
 0x442   :  { %v3251_v4 = vadd.f32 %v3250_v62, %v3210_v56  ;;  %v3292_v26 = vadd.f32 %v3291_v2, %v2526_v24  ;;  %v4187_v2 = vld [vmem:[#allocation2] ss:$0 sm:$0xff] }
 0x443   :  { %v3252_v5 = vpop.f32.mrf.mxu1  ;;  %v3293_v6 = vpop.f32.mrf.mxu0 }
 0x444   :  { %v3343_v7 = vmul.f32 0.70710677, %v3251_v4  ;;  %v3253_v8 = vadd.f32 %v3252_v5, %v3212_v3  ;;  %v3339_v39 = vmul.f32 0.5, %v3251_v4  ;;  %v3294_v29 = vadd.f32 %v3293_v6, %v2530_v25 }
 0x445   :  { %v3254_v9 = vpop.f32.mrf.mxu1  ;;  %v3295_v10 = vpop.f32.mrf.mxu0 }
 0x446   :  { %4917 = verf.f32 %v3343_v7  ;;  %v3344_v11 = vmul.f32 0.70710677, %v3253_v8  ;;  %v3340_v17 = vmul.f32 0.5, %v3253_v8 }
 0x447   :  { %v3255_v12 = vpop.f32.mrf.mxu1  ;;  %v3296_v13 = vpop.f32.mrf.mxu0 }
 0x448   :  { %4919 = verf.f32 %v3344_v11 }
 0x453   :  { %v4918_v14 = vpop.eup %4917 }
 0x454   :  { %v3351_v36 = vadd.f32 1.0, %v4918_v14 }
 0x455   :  { %v4920_v16 = vpop.eup %4919 }
 0x456   :  { %v3352_v19 = vadd.f32 1.0, %v4920_v16  ;;  %v3355_v20 = vmul.f32 %v3351_v36, %v3339_v39 }
 0x458   :  { %v3356_v21 = vmul.f32 %v3352_v19, %v3340_v17  ;;  %v3359_v23 = vpack.c.bf16 %v3355_v20, %v3355_v20 }
 0x45a   :  { %v3360_v22 = vpack.c.bf16 %v3356_v21, %v3356_v21 }
 0x45c   :  { %3658 = vmatprep.mubr.bf16.mxu0 %v3360_v22 }
 0x45d   :  { %3659 = vmatmul.mubr.bf16.vlgmr.msra.gmra.mxu0 %v3359_v23 }
 0x481   :  { %v3332_v28 = vpop.f32.mrf.mxu1 }
 0x482   :  { %v3333_v30 = vadd.f32 %v3332_v28, %v3292_v26 }
 0x483   :  { %v3334_v27 = vpop.f32.mrf.mxu1 }
 0x484   :  { %v3345_v31 = vmul.f32 0.70710677, %v3333_v30  ;;  %v3335_v15 = vadd.f32 %v3334_v27, %v3294_v29  ;;  %v3341_v41 = vmul.f32 0.5, %v3333_v30 }
 0x485   :  { %v3336_v18 = vpop.f32.mrf.mxu1 }
 0x486   :  { %4921 = verf.f32 %v3345_v31  ;;  %v3346_v32 = vmul.f32 0.70710677, %v3335_v15  ;;  %v3342_v42 = vmul.f32 0.5, %v3335_v15 }
 0x487   :  { %v3337_v33 = vpop.f32.mrf.mxu1 }
 0x488   :  { %4923 = verf.f32 %v3346_v32 }
 0x493   :  { %v4922_v34 = vpop.eup %4921 }
 0x494   :  { %v3353_v35 = vadd.f32 1.0, %v4922_v34 }
 0x495   :  { %v4924_v38 = vpop.eup %4923 }
 0x496   :  { %v3354_v37 = vadd.f32 1.0, %v4924_v38  ;;  %v3357_v43 = vmul.f32 %v3353_v35, %v3341_v41 }
 0x498   :  { %v3358_v40 = vmul.f32 %v3354_v37, %v3342_v42  ;;  %v3361_v45 = vpack.c.bf16 %v3357_v43, %v3357_v43 }
 0x49a   :  { %v3362_v44 = vpack.c.bf16 %v3358_v40, %v3358_v40 }
 0x49c   :  { %3698 = vmatprep.mubr.bf16.mxu1 %v3362_v44 }
 0x49d   :  { %3699 = vmatmul.mubr.bf16.vlgmr.msra.gmra.mxu1 %v3361_v45 }
 0x51d   :  { %v4204_v46 = vpop.f32.mrf.mxu0 }
 0x51f   :  { %v4205_v47 = vpop.f32.mrf.mxu0 }
 0x520   :  { %v4206_v50 = vadd.f32 %v4205_v47, %v4204_v46 }
 0x521   :  { %v4207_v48 = vpop.f32.mrf.mxu0 }
 0x522   :  { %v3661_v53 = vadd.f32 %v4206_v50, %v4153_v51 }
 0x523   :  { %v4208_v49 = vpop.f32.mrf.mxu0 }
 0x55d   :  { %v4226_v52 = vpop.f32.mrf.mxu1 }
 0x55f   :  { %v4227_v54 = vpop.f32.mrf.mxu1 }
 0x560   :  { %v4228_v55 = vadd.f32 %v4227_v54, %v4226_v52 }
 0x561   :  { %v4229_v57 = vpop.f32.mrf.mxu1 }
 0x562   :  { %v3701_v58 = vadd.f32 %v4228_v55, %v3661_v53 }
 0x563   :  { %v4230_v59 = vpop.f32.mrf.mxu1 }
 0x564   :  { %v3707_v60 = vmul.f32 0.70710677, %v3701_v58  ;;  %v3706_v63 = vmul.f32 0.5, %v3701_v58 }
 0x566   :  { %4925 = verf.f32 %v3707_v60 }
 0x573   :  { %v4926_v61 = vpop.eup %4925 }
 0x574   :  { %v3709_v0 = vadd.f32 1.0, %v4926_v61 }
 0x576   :  { %v3710_v56 = vmul.f32 %v3709_v0, %v3706_v63 }
 0x578   :  { %v3718_v62 = vmul.f32 %v4186_v1, %v3710_v56 }
 0x57a   :  { %3719 = vadd.xlane.f32.xlu0 %v3718_v62 }
 0x603   :  { %v3720_v3 = vpop.xlane.xlu0 %3719 }
 0x604   :  { %v3728_v4 = vadd.f32 %v4187_v2, %v3720_v3 }
 0x606   :  { %3730 = vst.msk [vmem:[%s5269_s13] sm:$0xff] %vm3729_vm1, %v3728_v4 }
 0x607   :  { %3735 = vsyncpa [#allocation4], 1 }
 0x608   :  { %3736 = vsyncpa [#allocation6], 1 }
 0x609   :  { %3737 = vsyncpa [#allocation9], 1 }
 0x60a   :  { %3738 = vsyncpa [#allocation12], 1 }

</bundles_post_ra>
